<compile_context>
chip_gen: v6e
topology: v6e:2x2x1
jax: 0.10.0
libtpu: 0.0.40
codegen_flags: <defaults>
</compile_context>

<pallas_src>
import math
import numpy as np
import jax
import jax.numpy as jnp
from jax import lax
from jax.experimental import pallas as pl
from jax.experimental.pallas import tpu as pltpu

# Primitive op vocabulary (PRIMITIVES is external in the original code).
PRIMITIVES = ['input', 'conv', 'bn', 'relu', 'pool', 'fc', 'sum', 'concat']

_LANE = 128
_SUBLANE = 8


def _round_up(v, m):
    return ((v + m - 1) // m) * m


def _pad_to(x, shape):
    """Zero-pad a 2-D array up to `shape`."""
    out = jnp.zeros(shape, x.dtype)
    return out.at[tuple(slice(0, s) for s in x.shape)].set(x)


# ------------------------------ Pallas kernel -------------------------------

def _make_ghn_kernel(true_hid, use_layernorm, use_bf16):
    """Build the fused GHN forward kernel (config baked in at trace time)."""

    def mm(a, b):
        if use_bf16:
            a = a.astype(jnp.bfloat16)
            b = b.astype(jnp.bfloat16)
        return jnp.dot(a, b, preferred_element_type=jnp.float32)

    def kernel(nt_ref, seq_ref, em_ref, nm_ref, noh_ref, cf_ref,
               tab_ref, wew_ref, web_ref,
               cw1_ref, cb1_ref, cw2_ref, cb2_ref,
               lng_ref, lnb_ref,
               dw1_ref, db1_ref, dw2_ref, db2_ref,
               cdw_ref, cdb_ref, clsw_ref, clsb_ref,
               x_out_ref, conv_out_ref, cls_out_ref):
        tile_n = nt_ref.shape[0]
        n_prims = tab_ref.shape[0]

        # ---- node-type embedding gather done in-kernel as a one-hot matmul
        nt = nt_ref[...]                                           # (T, 1) i32
        prim = lax.broadcasted_iota(jnp.int32, (tile_n, n_prims), 1)
        onehot = (prim == nt).astype(jnp.float32)
        x = mm(onehot, tab_ref[...])                               # (T, HP)
        # TODO(synk): ShapeEncoder source not provided; shape-conditioned bias omitted.

        # ---- weight encoding stand-in: masked linear projection.  Per-element
        # mask zeroes the pad_sequence(-1) positions and the lane padding; the
        # per-node mask zeroes nodes that carry no weights.
        # TODO(synk): TransformerEncoder(d_model=H, nhead=4) source not provided.
        seq = seq_ref[...] * em_ref[...]
        w_emb = (mm(seq, wew_ref[...]) + web_ref[...]) * nm_ref[...]

        # ---- client_enc: Linear(C,H) -> ReLU -> Linear(H,2H)   (fp32 VPU math)
        ch = jnp.maximum(mm(cf_ref[...], cw1_ref[...]) + cb1_ref[...], 0.0)
        client_embs = mm(ch, cw2_ref[...]) + cb2_ref[...]          # (B, H2P)

        # ---- x += weight_emb ; LayerNorm over the TRUE hidden lanes only
        # TODO(synk): GatedGNN source not provided; graph propagation omitted (identity).
        xw = x + w_emb
        if use_layernorm:
            lane = lax.broadcasted_iota(jnp.int32, xw.shape, 1)
            hmask = (lane < true_hid).astype(jnp.float32)
            xw = xw * hmask
            mu = jnp.sum(xw, axis=-1, keepdims=True) * (1.0 / true_hid)
            cent = (xw - mu) * hmask
            var = jnp.sum(cent * cent, axis=-1, keepdims=True) * (1.0 / true_hid)
            xw = cent * lax.rsqrt(var + 1e-5) * lng_ref[...] + lnb_ref[...]
        x_out_ref[...] = xw

        # ---- generic decoder ('conv'): batched over ALL node rows
        dh = jnp.maximum(mm(xw, dw1_ref[...]) + db1_ref[...], 0.0)
        conv_out_ref[...] = mm(dh, dw2_ref[...]) + db2_ref[...]

        # ---- classifier path: decoder hidden + per-node client embedding,
        # ReLU, Linear(2H, prod(classifier_shape)); net_map gather done as a
        # one-hot matmul against client_embs (stays in VMEM/vregs).
        chid = mm(xw, cdw_ref[...]) + cdb_ref[...]                 # (T, H2P)
        emb = mm(noh_ref[...], client_embs)                        # (T, H2P)
        chid = jnp.maximum(chid + emb, 0.0)
        cls_out_ref[...] = mm(chid, clsw_ref[...]) + clsb_ref[...]

    return kernel


# --------------------------------- glue -------------------------------------

def tile_params(w, target_shape):
    """JAX port of GHN._tile_params (slice to min, tile along dims 0/1, slice)."""
    t = tuple(target_shape)
    s = w.shape
    w = w[tuple(slice(0, min(ti, si)) for ti, si in zip(t, s))]
    s = w.shape
    if t[0] > s[0]:
        n_out = int(np.ceil(t[0] / s[0]))
        reps = (n_out,) + (1,) * (len(t) - 1)
        w = jnp.tile(w, reps)[:t[0]]
    if len(t) > 1 and t[1] > w.shape[1]:
        n_in = int(np.ceil(t[1] / w.shape[1]))
        reps = (1, n_in) + (1,) * (len(t) - 2)
        w = jnp.tile(w, reps)
    w = w[tuple(slice(0, ti) for ti in t)]
    return w


def _linear_init(key, fan_in, fan_out):
    kw, kb = jax.random.split(key)
    bound = 1.0 / math.sqrt(fan_in)
    w = jax.random.uniform(kw, (fan_in, fan_out), jnp.float32, -bound, bound)
    b = jax.random.uniform(kb, (1, fan_out), jnp.float32, -bound, bound)
    return w, b


class GHNPallas:
    """Pallas/JAX re-implementation of the defined compute of GHN.forward."""

    def __init__(self, max_shape, classifier_shape, max_param_len, num_classes,
                 node_hid=32, layernorm=True, use_bf16_matmul=True,
                 key=jax.random.PRNGKey(0)):
        self.max_shape = max_shape
        self.classifier_shape = classifier_shape
        self.max_param_len = max_param_len
        self.num_classes = num_classes
        self.layernorm = layernorm
        self.use_bf16_matmul = use_bf16_matmul
        self.tile_n = 8

        # true vs. lane-padded feature widths
        self.H = node_hid
        self.HP = _round_up(node_hid, _LANE)
        self.H2 = 2 * node_hid
        self.H2P = _round_up(self.H2, _LANE)
        self.CP = _round_up(num_classes, _LANE)
        self.LP = _round_up(max_param_len, _LANE)

        keys = jax.random.split(key, 16)
        H, H2, C, L = self.H, self.H2, num_classes, max_param_len
        HP, H2P, CP, LP = self.HP, self.H2P, self.CP, self.LP

        # nn.Embedding(len(PRIMITIVES), node_hid) -- zero-padded to HP lanes
        emb = jax.random.normal(keys[0], (len(PRIMITIVES), H), jnp.float32)
        self.node_embed = _pad_to(emb, (len(PRIMITIVES), HP))

        # client_enc = Linear(C,H) -> ReLU -> Linear(H, 2H)
        w, b = _linear_init(keys[1], C, H)
        self.ce_w1, self.ce_b1 = _pad_to(w, (CP, HP)), _pad_to(b, (1, HP))
        w, b = _linear_init(keys[2], H, H2)
        self.ce_w2, self.ce_b2 = _pad_to(w, (HP, H2P)), _pad_to(b, (1, H2P))

        # weight_enc stand-in (masked linear projection of padded weight seq)
        w, b = _linear_init(keys[3], L, H)
        self.we_w, self.we_b = _pad_to(w, (LP, HP)), _pad_to(b, (1, HP))

        # nn.LayerNorm(node_hid) -- pad lanes of gamma/beta are zero so padded
        # output lanes stay exactly zero.
        self.ln_g = _pad_to(jnp.ones((1, H), jnp.float32), (1, HP))
        self.ln_b = jnp.zeros((1, HP), jnp.float32)

        # TODO(synk): MLPDecoder source not provided; generic decoder stand-in
        # is Linear(H,2H) -> ReLU -> Linear(2H, prod(max_shape[node_type])).
        self.decoders = {}
        ki = 4
        for node_type, shape in max_shape.items():
            p = int(np.prod(shape))
            pp = _round_up(p, _LANE)
            w1, b1 = _linear_init(keys[ki], H, H2)
            w2, b2 = _linear_init(keys[ki + 1], H2, p)
            self.decoders[node_type] = (_pad_to(w1, (HP, H2P)), _pad_to(b1, (1, H2P)),
                                        _pad_to(w2, (H2P, pp)), _pad_to(b2, (1, pp)),
                                        p, pp)
            ki += 2

        # classifier decoder hidden (MLPDecoder class_pred=True stand-in)
        w, b = _linear_init(keys[ki], H, H2)
        self.cd_w, self.cd_b = _pad_to(w, (HP, H2P)), _pad_to(b, (1, H2P))
        ki += 1

        # decoder_{param_name}: nn.Sequential(ReLU, Linear(2H, prod(s)))
        self.cls_heads = {}
        for k, s in classifier_shape.items():
            p = int(np.prod(s))
            pp = _round_up(p, _LANE)
            w, b = _linear_init(keys[ki], H2, p)
            self.cls_heads[k] = (_pad_to(w, (H2P, pp)), _pad_to(b, (1, pp)), p, pp)
            ki += 1

    # ---------------------------- fused kernel call -------------------------

    def _fused_call(self, nt, seq, em, nm, noh, cf, dw1, db1, dw2, db2,
                    cls_w, cls_b):
        n_pad = nt.shape[0]
        b_pad = cf.shape[0]
        HP, H2P, CP, LP = self.HP, self.H2P, self.CP, self.LP
        p_conv_pad = dw2.shape[1]
        p_cls_pad = cls_w.shape[1]
        n_prims = self.node_embed.shape[0]
        tile_n = min(self.tile_n, n_pad)
        grid = (n_pad // tile_n,)

        kernel = _make_ghn_kernel(self.H, self.layernorm, self.use_bf16_matmul)

        def rows(i):      # row-tiled operands
            return (i, 0)

        def full(i):      # whole-array resident operands (weights/biases)
            return (0, 0)

        in_specs = [
            pl.BlockSpec((tile_n, 1), rows),             # node_types
            pl.BlockSpec((tile_n, LP), rows),            # weight_seqs
            pl.BlockSpec((tile_n, LP), rows),            # elem mask
            pl.BlockSpec((tile_n, 1), rows),             # node mask
            pl.BlockSpec((tile_n, b_pad), rows),         # net one-hot
            pl.BlockSpec((b_pad, CP), full),             # client_features
            pl.BlockSpec((n_prims, HP), full),           # embed table
            pl.BlockSpec((LP, HP), full), pl.BlockSpec((1, HP), full),       # we
            pl.BlockSpec((CP, HP), full), pl.BlockSpec((1, HP), full),       # ce1
            pl.BlockSpec((HP, H2P), full), pl.BlockSpec((1, H2P), full),     # ce2
            pl.BlockSpec((1, HP), full), pl.BlockSpec((1, HP), full),        # ln
            pl.BlockSpec((HP, H2P), full), pl.BlockSpec((1, H2P), full),     # dec w1
            pl.BlockSpec((H2P, p_conv_pad), full), pl.BlockSpec((1, p_conv_pad), full),
            pl.BlockSpec((HP, H2P), full), pl.BlockSpec((1, H2P), full),     # cd
            pl.BlockSpec((H2P, p_cls_pad), full), pl.BlockSpec((1, p_cls_pad), full),
        ]
        out_specs = [
            pl.BlockSpec((tile_n, HP), rows),
            pl.BlockSpec((tile_n, p_conv_pad), rows),
            pl.BlockSpec((tile_n, p_cls_pad), rows),
        ]
        out_shape = (jax.ShapeDtypeStruct((n_pad, HP), jnp.float32),
                     jax.ShapeDtypeStruct((n_pad, p_conv_pad), jnp.float32),
                     jax.ShapeDtypeStruct((n_pad, p_cls_pad), jnp.float32))

        args = (nt, seq, em, nm, noh, cf, self.node_embed, self.we_w, self.we_b,
                self.ce_w1, self.ce_b1, self.ce_w2, self.ce_b2,
                self.ln_g, self.ln_b, dw1, db1, dw2, db2,
                self.cd_w, self.cd_b, cls_w, cls_b)

        bytes_accessed = sum(int(np.prod(a.shape)) * a.dtype.itemsize for a in args)
        bytes_accessed += sum(int(np.prod(s.shape)) * 4 for s in out_shape)
        flops = 2 * n_pad * (n_prims * HP + LP * HP + HP * H2P + H2P * p_conv_pad
                             + HP * H2P + b_pad * H2P + H2P * p_cls_pad)
        flops += 2 * b_pad * (CP * HP + HP * H2P)

        return pl.pallas_call(
            kernel,
            out_shape=out_shape,
            grid_spec=pltpu.PrefetchScalarGridSpec(
                num_scalar_prefetch=0,
                grid=grid,
                in_specs=in_specs,
                out_specs=out_specs),
            compiler_params=pltpu.CompilerParams(
                dimension_semantics=("parallel",),
                vmem_limit_bytes=32 * 1024 * 1024),
            cost_estimate=pl.CostEstimate(
                flops=int(flops),
                transcendentals=int(n_pad if self.layernorm else 0),
                bytes_accessed=int(bytes_accessed)),
        )(*args)

    # --------------------------------- forward ------------------------------

    def forward(self, client_features, node_types, weight_seqs, weight_valid,
                net_map, conv_node, conv_target_shape, cls_node, cls_param_name):
        n_nodes = int(node_types.shape[0])
        n_nets = int(client_features.shape[0])
        n_pad = _round_up(n_nodes, self.tile_n)
        b_pad = _round_up(n_nets, _SUBLANE)

        # row/lane zero-padding of per-node inputs (pads are masked or sliced off)
        nt = _pad_to(node_types.reshape(n_nodes, 1).astype(jnp.int32), (n_pad, 1))
        seq = _pad_to(weight_seqs.astype(jnp.float32), (n_pad, self.LP))
        em = _pad_to(weight_valid.astype(jnp.float32), (n_pad, self.LP))
        nm = (jnp.sum(em, axis=-1, keepdims=True) > 0).astype(jnp.float32)
        noh = _pad_to(jax.nn.one_hot(jnp.asarray(net_map, jnp.int32), n_nets,
                                     dtype=jnp.float32), (n_pad, b_pad))
        cf = _pad_to(client_features.astype(jnp.float32), (b_pad, self.CP))

        dw1, db1, dw2, db2, p_conv, _ = self.decoders['conv']
        cls_w, cls_b, p_cls, _ = self.cls_heads[cls_param_name]

        x_out, conv_out, cls_out = self._fused_call(
            nt, seq, em, nm, noh, cf, dw1, db1, dw2, db2, cls_w, cls_b)

        embeddings = x_out[:n_nodes, :self.H]

        predicted = {}
        w_pred = conv_out[conv_node, :p_conv].reshape(self.max_shape['conv'])
        predicted['conv.weight'] = tile_params(w_pred, conv_target_shape)
        predicted[cls_param_name] = cls_out[cls_node, :p_cls].reshape(
            self.classifier_shape[cls_param_name])
        # TODO(synk): _set_params / weight_norm write predicted tensors into live
        # torch modules; no JAX equivalent, caller consumes `predicted` directly.
        return predicted, embeddings


# --------------------------------- main -------------------------------------

if __name__ == "__main__":
    key = jax.random.PRNGKey(0)
    k_cf, k_wt, k_model = jax.random.split(key, 3)

    num_classes = 10
    node_hid = 32
    max_param_len = 16
    num_nets = 2
    n_nodes = 8

    max_shape = {'conv': (8, 8, 3, 3), 'bn': (8,)}
    classifier_shape = {'classifier.weight': (num_classes, 16)}

    ghn = GHNPallas(max_shape, classifier_shape, max_param_len, num_classes,
                    node_hid=node_hid, layernorm=True, use_bf16_matmul=True,
                    key=k_model)

    # client features, one per client network
    client_features = jax.random.normal(k_cf, (num_nets, num_classes),
                                        jnp.float32)

    # synthetic graph nodes (two tiny nets, 4 nodes each)
    node_types = jnp.array([0, 1, 2, 5, 0, 1, 2, 5], dtype=jnp.int32)
    net_map = jnp.array([0, 0, 0, 0, 1, 1, 1, 1], dtype=jnp.int32)

    # padded per-node flattened-weight sequences (padding value -1, mirroring
    # pad_sequence(..., padding_value=-1)); nodes 0 and 4 ('input') carry none.
    weight_seqs = jax.random.normal(k_wt, (n_nodes, max_param_len), jnp.float32)
    weight_seqs = weight_seqs.at[:, max_param_len // 2:].set(-1.0)
    weight_valid = jnp.zeros((n_nodes, max_param_len), jnp.float32)
    weight_valid = weight_valid.at[:, :max_param_len // 2].set(1.0)
    weight_valid = weight_valid.at[0, :].set(0.0).at[4, :].set(0.0)

    predicted, embeddings = ghn.forward(
        client_features, node_types, weight_seqs, weight_valid, net_map,
        conv_node=1, conv_target_shape=(12, 8, 3, 3),
        cls_node=3, cls_param_name='classifier.weight')

    jax.block_until_ready(predicted)
    jax.block_until_ready(embeddings)

    assert predicted['conv.weight'].shape == (12, 8, 3, 3)
    assert predicted['classifier.weight'].shape == (num_classes, 16)
    assert embeddings.shape == (n_nodes, node_hid)
    assert all(bool(jnp.all(jnp.isfinite(v))) for v in predicted.values())
    assert bool(jnp.all(jnp.isfinite(embeddings)))

    print("KERNEL_OK")
</pallas_src>

<mosaic_0001>
module attributes {stable_mosaic.version = 11 : i64} {
  func.func @kernel(%arg0: i32, %arg1: memref<8x1xi32, #tpu.memory_space<vmem>>, %arg2: memref<8x128xf32, #tpu.memory_space<vmem>>, %arg3: memref<8x128xf32, #tpu.memory_space<vmem>>, %arg4: memref<8x1xf32, #tpu.memory_space<vmem>>, %arg5: memref<8x8xf32, #tpu.memory_space<vmem>>, %arg6: memref<8x128xf32, #tpu.memory_space<vmem>>, %arg7: memref<8x128xf32, #tpu.memory_space<vmem>>, %arg8: memref<128x128xf32, #tpu.memory_space<vmem>>, %arg9: memref<1x128xf32, #tpu.memory_space<vmem>>, %arg10: memref<128x128xf32, #tpu.memory_space<vmem>>, %arg11: memref<1x128xf32, #tpu.memory_space<vmem>>, %arg12: memref<128x128xf32, #tpu.memory_space<vmem>>, %arg13: memref<1x128xf32, #tpu.memory_space<vmem>>, %arg14: memref<1x128xf32, #tpu.memory_space<vmem>>, %arg15: memref<1x128xf32, #tpu.memory_space<vmem>>, %arg16: memref<128x128xf32, #tpu.memory_space<vmem>>, %arg17: memref<1x128xf32, #tpu.memory_space<vmem>>, %arg18: memref<128x640xf32, #tpu.memory_space<vmem>>, %arg19: memref<1x640xf32, #tpu.memory_space<vmem>>, %arg20: memref<128x128xf32, #tpu.memory_space<vmem>>, %arg21: memref<1x128xf32, #tpu.memory_space<vmem>>, %arg22: memref<128x256xf32, #tpu.memory_space<vmem>>, %arg23: memref<1x256xf32, #tpu.memory_space<vmem>>, %arg24: memref<8x128xf32, #tpu.memory_space<vmem>>, %arg25: memref<8x640xf32, #tpu.memory_space<vmem>>, %arg26: memref<8x256xf32, #tpu.memory_space<vmem>>) attributes {dimension_semantics = [#tpu.dimension_semantics<parallel>], iteration_bounds = array<i64: 1>, scalar_prefetch = 0 : i64, scratch_operands = 0 : i64, tpu.core_type = #tpu.core_type<tc>, window_params = [{transform_indices = @transform_0, window_bounds = array<i64: 8, 1>}, {transform_indices = @transform_1, window_bounds = array<i64: 8, 128>}, {transform_indices = @transform_2, window_bounds = array<i64: 8, 128>}, {transform_indices = @transform_3, window_bounds = array<i64: 8, 1>}, {transform_indices = @transform_4, window_bounds = array<i64: 8, 8>}, {pipeline_mode = #tpu.pipeline_mode<synchronous>, transform_indices = @transform_5, window_bounds = array<i64: 8, 128>}, {pipeline_mode = #tpu.pipeline_mode<synchronous>, transform_indices = @transform_6, window_bounds = array<i64: 8, 128>}, {pipeline_mode = #tpu.pipeline_mode<synchronous>, transform_indices = @transform_7, window_bounds = array<i64: 128, 128>}, {pipeline_mode = #tpu.pipeline_mode<synchronous>, transform_indices = @transform_8, window_bounds = array<i64: 1, 128>}, {pipeline_mode = #tpu.pipeline_mode<synchronous>, transform_indices = @transform_9, window_bounds = array<i64: 128, 128>}, {pipeline_mode = #tpu.pipeline_mode<synchronous>, transform_indices = @transform_10, window_bounds = array<i64: 1, 128>}, {pipeline_mode = #tpu.pipeline_mode<synchronous>, transform_indices = @transform_11, window_bounds = array<i64: 128, 128>}, {pipeline_mode = #tpu.pipeline_mode<synchronous>, transform_indices = @transform_12, window_bounds = array<i64: 1, 128>}, {pipeline_mode = #tpu.pipeline_mode<synchronous>, transform_indices = @transform_13, window_bounds = array<i64: 1, 128>}, {pipeline_mode = #tpu.pipeline_mode<synchronous>, transform_indices = @transform_14, window_bounds = array<i64: 1, 128>}, {pipeline_mode = #tpu.pipeline_mode<synchronous>, transform_indices = @transform_15, window_bounds = array<i64: 128, 128>}, {pipeline_mode = #tpu.pipeline_mode<synchronous>, transform_indices = @transform_16, window_bounds = array<i64: 1, 128>}, {pipeline_mode = #tpu.pipeline_mode<synchronous>, transform_indices = @transform_17, window_bounds = array<i64: 128, 640>}, {pipeline_mode = #tpu.pipeline_mode<synchronous>, transform_indices = @transform_18, window_bounds = array<i64: 1, 640>}, {pipeline_mode = #tpu.pipeline_mode<synchronous>, transform_indices = @transform_19, window_bounds = array<i64: 128, 128>}, {pipeline_mode = #tpu.pipeline_mode<synchronous>, transform_indices = @transform_20, window_bounds = array<i64: 1, 128>}, {pipeline_mode = #tpu.pipeline_mode<synchronous>, transform_indices = @transform_21, window_bounds = array<i64: 128, 256>}, {pipeline_mode = #tpu.pipeline_mode<synchronous>, transform_indices = @transform_22, window_bounds = array<i64: 1, 256>}, {transform_indices = @transform_23, window_bounds = array<i64: 8, 128>}, {transform_indices = @transform_24, window_bounds = array<i64: 8, 640>}, {transform_indices = @transform_25, window_bounds = array<i64: 8, 256>}]} {
    %c0 = arith.constant 0 : index
    %c0_0 = arith.constant 0 : index
    %0 = vector.load %arg1[%c0, %c0_0] : memref<8x1xi32, #tpu.memory_space<vmem>>, vector<8x1xi32>
    %1 = tpu.iota {dimensions = array<i32: 1>} : vector<8x8xi32>
    %2 = vector.broadcast %0 : vector<8x1xi32> to vector<8x8xi32>
    %3 = arith.cmpi eq, %1, %2 : vector<8x8xi32>
    %4 = arith.extui %3 : vector<8x8xi1> to vector<8x8xi32>
    %5 = arith.sitofp %4 : vector<8x8xi32> to vector<8x8xf32>
    %c0_1 = arith.constant 0 : index
    %c0_2 = arith.constant 0 : index
    %6 = vector.load %arg7[%c0_1, %c0_2] : memref<8x128xf32, #tpu.memory_space<vmem>>, vector<8x128xf32>
    %7 = arith.truncf %5 : vector<8x8xf32> to vector<8x8xbf16>
    %8 = arith.truncf %6 : vector<8x128xf32> to vector<8x128xbf16>
    %cst = arith.constant dense<0.000000e+00> : vector<8x128xf32>
    %9 = tpu.matmul %7, %8, %cst {dimension_numbers = #tpu.dot_dimension_numbers<[1], [0], [0], [1], [0, 0, 1, 1], [], []>} : vector<8x8xbf16>, vector<8x128xbf16>, vector<8x128xf32> -> vector<8x128xf32>
    %c0_3 = arith.constant 0 : index
    %c0_4 = arith.constant 0 : index
    %10 = vector.load %arg2[%c0_3, %c0_4] : memref<8x128xf32, #tpu.memory_space<vmem>>, vector<8x128xf32>
    %c0_5 = arith.constant 0 : index
    %c0_6 = arith.constant 0 : index
    %11 = vector.load %arg3[%c0_5, %c0_6] : memref<8x128xf32, #tpu.memory_space<vmem>>, vector<8x128xf32>
    %12 = arith.mulf %10, %11 : vector<8x128xf32>
    %c0_7 = arith.constant 0 : index
    %c0_8 = arith.constant 0 : index
    %13 = vector.load %arg8[%c0_7, %c0_8] : memref<128x128xf32, #tpu.memory_space<vmem>>, vector<128x128xf32>
    %14 = arith.truncf %12 : vector<8x128xf32> to vector<8x128xbf16>
    %15 = arith.truncf %13 : vector<128x128xf32> to vector<128x128xbf16>
    %cst_9 = arith.constant dense<0.000000e+00> : vector<8x128xf32>
    %16 = tpu.matmul %14, %15, %cst_9 {dimension_numbers = #tpu.dot_dimension_numbers<[1], [0], [0], [1], [0, 0, 1, 1], [], []>} : vector<8x128xbf16>, vector<128x128xbf16>, vector<8x128xf32> -> vector<8x128xf32>
    %c0_10 = arith.constant 0 : index
    %c0_11 = arith.constant 0 : index
    %17 = vector.load %arg9[%c0_10, %c0_11] : memref<1x128xf32, #tpu.memory_space<vmem>>, vector<1x128xf32>
    %18 = vector.broadcast %17 : vector<1x128xf32> to vector<8x128xf32>
    %19 = arith.addf %16, %18 : vector<8x128xf32>
    %c0_12 = arith.constant 0 : index
    %c0_13 = arith.constant 0 : index
    %20 = vector.load %arg4[%c0_12, %c0_13] : memref<8x1xf32, #tpu.memory_space<vmem>>, vector<8x1xf32>
    %21 = vector.broadcast %20 : vector<8x1xf32> to vector<8x128xf32>
    %22 = arith.mulf %19, %21 : vector<8x128xf32>
    %c0_14 = arith.constant 0 : index
    %c0_15 = arith.constant 0 : index
    %23 = vector.load %arg6[%c0_14, %c0_15] : memref<8x128xf32, #tpu.memory_space<vmem>>, vector<8x128xf32>
    %c0_16 = arith.constant 0 : index
    %c0_17 = arith.constant 0 : index
    %24 = vector.load %arg10[%c0_16, %c0_17] : memref<128x128xf32, #tpu.memory_space<vmem>>, vector<128x128xf32>
    %25 = arith.truncf %23 : vector<8x128xf32> to vector<8x128xbf16>
    %26 = arith.truncf %24 : vector<128x128xf32> to vector<128x128xbf16>
    %cst_18 = arith.constant dense<0.000000e+00> : vector<8x128xf32>
    %27 = tpu.matmul %25, %26, %cst_18 {dimension_numbers = #tpu.dot_dimension_numbers<[1], [0], [0], [1], [0, 0, 1, 1], [], []>} : vector<8x128xbf16>, vector<128x128xbf16>, vector<8x128xf32> -> vector<8x128xf32>
    %c0_19 = arith.constant 0 : index
    %c0_20 = arith.constant 0 : index
    %28 = vector.load %arg11[%c0_19, %c0_20] : memref<1x128xf32, #tpu.memory_space<vmem>>, vector<1x128xf32>
    %29 = vector.broadcast %28 : vector<1x128xf32> to vector<8x128xf32>
    %30 = arith.addf %27, %29 : vector<8x128xf32>
    %cst_21 = arith.constant 0.000000e+00 : f32
    %31 = vector.broadcast %cst_21 : f32 to vector<8x128xf32>
    %32 = arith.maximumf %30, %31 : vector<8x128xf32>
    %c0_22 = arith.constant 0 : index
    %c0_23 = arith.constant 0 : index
    %33 = vector.load %arg12[%c0_22, %c0_23] : memref<128x128xf32, #tpu.memory_space<vmem>>, vector<128x128xf32>
    %34 = arith.truncf %32 : vector<8x128xf32> to vector<8x128xbf16>
    %35 = arith.truncf %33 : vector<128x128xf32> to vector<128x128xbf16>
    %cst_24 = arith.constant dense<0.000000e+00> : vector<8x128xf32>
    %36 = tpu.matmul %34, %35, %cst_24 {dimension_numbers = #tpu.dot_dimension_numbers<[1], [0], [0], [1], [0, 0, 1, 1], [], []>} : vector<8x128xbf16>, vector<128x128xbf16>, vector<8x128xf32> -> vector<8x128xf32>
    %c0_25 = arith.constant 0 : index
    %c0_26 = arith.constant 0 : index
    %37 = vector.load %arg13[%c0_25, %c0_26] : memref<1x128xf32, #tpu.memory_space<vmem>>, vector<1x128xf32>
    %38 = vector.broadcast %37 : vector<1x128xf32> to vector<8x128xf32>
    %39 = arith.addf %36, %38 : vector<8x128xf32>
    %40 = arith.addf %9, %22 : vector<8x128xf32>
    %41 = tpu.iota {dimensions = array<i32: 1>} : vector<8x128xi32>
    %c32_i32 = arith.constant 32 : i32
    %42 = vector.broadcast %c32_i32 : i32 to vector<8x128xi32>
    %43 = arith.cmpi slt, %41, %42 : vector<8x128xi32>
    %44 = arith.extui %43 : vector<8x128xi1> to vector<8x128xi32>
    %45 = arith.sitofp %44 : vector<8x128xi32> to vector<8x128xf32>
    %46 = arith.mulf %40, %45 : vector<8x128xf32>
    %cst_27 = arith.constant dense<0.000000e+00> : vector<8xf32>
    %47 = vector.multi_reduction <add>, %46, %cst_27 [1] : vector<8x128xf32> to vector<8xf32>
    %48 = vector.shape_cast %47 : vector<8xf32> to vector<8x1xf32>
    %cst_28 = arith.constant 3.125000e-02 : f32
    %49 = vector.broadcast %cst_28 : f32 to vector<8x1xf32>
    %50 = arith.mulf %48, %49 : vector<8x1xf32>
    %51 = vector.broadcast %50 : vector<8x1xf32> to vector<8x128xf32>
    %52 = arith.subf %46, %51 : vector<8x128xf32>
    %53 = arith.mulf %52, %45 : vector<8x128xf32>
    %54 = arith.mulf %53, %53 : vector<8x128xf32>
    %cst_29 = arith.constant dense<0.000000e+00> : vector<8xf32>
    %55 = vector.multi_reduction <add>, %54, %cst_29 [1] : vector<8x128xf32> to vector<8xf32>
    %56 = vector.shape_cast %55 : vector<8xf32> to vector<8x1xf32>
    %cst_30 = arith.constant 3.125000e-02 : f32
    %57 = vector.broadcast %cst_30 : f32 to vector<8x1xf32>
    %58 = arith.mulf %56, %57 : vector<8x1xf32>
    %cst_31 = arith.constant 9.99999974E-6 : f32
    %59 = vector.broadcast %cst_31 : f32 to vector<8x1xf32>
    %60 = arith.addf %58, %59 : vector<8x1xf32>
    %61 = math.rsqrt %60 : vector<8x1xf32>
    %62 = vector.broadcast %61 : vector<8x1xf32> to vector<8x128xf32>
    %63 = arith.mulf %53, %62 : vector<8x128xf32>
    %c0_32 = arith.constant 0 : index
    %c0_33 = arith.constant 0 : index
    %64 = vector.load %arg14[%c0_32, %c0_33] : memref<1x128xf32, #tpu.memory_space<vmem>>, vector<1x128xf32>
    %65 = vector.broadcast %64 : vector<1x128xf32> to vector<8x128xf32>
    %66 = arith.mulf %63, %65 : vector<8x128xf32>
    %c0_34 = arith.constant 0 : index
    %c0_35 = arith.constant 0 : index
    %67 = vector.load %arg15[%c0_34, %c0_35] : memref<1x128xf32, #tpu.memory_space<vmem>>, vector<1x128xf32>
    %68 = vector.broadcast %67 : vector<1x128xf32> to vector<8x128xf32>
    %69 = arith.addf %66, %68 : vector<8x128xf32>
    %c0_36 = arith.constant 0 : index
    %c0_37 = arith.constant 0 : index
    %70 = vector.load %arg24[%c0_36, %c0_37] : memref<8x128xf32, #tpu.memory_space<vmem>>, vector<8x128xf32>
    tpu.vector_store %arg24[%c0_36, %c0_37], %69 {strides = array<i32>} : memref<8x128xf32, #tpu.memory_space<vmem>>, vector<8x128xf32>,
    %c0_38 = arith.constant 0 : index
    %c0_39 = arith.constant 0 : index
    %71 = vector.load %arg16[%c0_38, %c0_39] : memref<128x128xf32, #tpu.memory_space<vmem>>, vector<128x128xf32>
    %72 = arith.truncf %69 : vector<8x128xf32> to vector<8x128xbf16>
    %73 = arith.truncf %71 : vector<128x128xf32> to vector<128x128xbf16>
    %cst_40 = arith.constant dense<0.000000e+00> : vector<8x128xf32>
    %74 = tpu.matmul %72, %73, %cst_40 {dimension_numbers = #tpu.dot_dimension_numbers<[1], [0], [0], [1], [0, 0, 1, 1], [], []>} : vector<8x128xbf16>, vector<128x128xbf16>, vector<8x128xf32> -> vector<8x128xf32>
    %c0_41 = arith.constant 0 : index
    %c0_42 = arith.constant 0 : index
    %75 = vector.load %arg17[%c0_41, %c0_42] : memref<1x128xf32, #tpu.memory_space<vmem>>, vector<1x128xf32>
    %76 = vector.broadcast %75 : vector<1x128xf32> to vector<8x128xf32>
    %77 = arith.addf %74, %76 : vector<8x128xf32>
    %cst_43 = arith.constant 0.000000e+00 : f32
    %78 = vector.broadcast %cst_43 : f32 to vector<8x128xf32>
    %79 = arith.maximumf %77, %78 : vector<8x128xf32>
    %c0_44 = arith.constant 0 : index
    %c0_45 = arith.constant 0 : index
    %80 = vector.load %arg18[%c0_44, %c0_45] : memref<128x640xf32, #tpu.memory_space<vmem>>, vector<128x640xf32>
    %81 = arith.truncf %79 : vector<8x128xf32> to vector<8x128xbf16>
    %82 = arith.truncf %80 : vector<128x640xf32> to vector<128x640xbf16>
    %cst_46 = arith.constant dense<0.000000e+00> : vector<8x640xf32>
    %83 = tpu.matmul %81, %82, %cst_46 {dimension_numbers = #tpu.dot_dimension_numbers<[1], [0], [0], [1], [0, 0, 1, 1], [], []>} : vector<8x128xbf16>, vector<128x640xbf16>, vector<8x640xf32> -> vector<8x640xf32>
    %c0_47 = arith.constant 0 : index
    %c0_48 = arith.constant 0 : index
    %84 = vector.load %arg19[%c0_47, %c0_48] : memref<1x640xf32, #tpu.memory_space<vmem>>, vector<1x640xf32>
    %85 = vector.broadcast %84 : vector<1x640xf32> to vector<8x640xf32>
    %86 = arith.addf %83, %85 : vector<8x640xf32>
    %c0_49 = arith.constant 0 : index
    %c0_50 = arith.constant 0 : index
    %87 = vector.load %arg25[%c0_49, %c0_50] : memref<8x640xf32, #tpu.memory_space<vmem>>, vector<8x640xf32>
    tpu.vector_store %arg25[%c0_49, %c0_50], %86 {strides = array<i32>} : memref<8x640xf32, #tpu.memory_space<vmem>>, vector<8x640xf32>,
    %c0_51 = arith.constant 0 : index
    %c0_52 = arith.constant 0 : index
    %88 = vector.load %arg20[%c0_51, %c0_52] : memref<128x128xf32, #tpu.memory_space<vmem>>, vector<128x128xf32>
    %89 = arith.truncf %69 : vector<8x128xf32> to vector<8x128xbf16>
    %90 = arith.truncf %88 : vector<128x128xf32> to vector<128x128xbf16>
    %cst_53 = arith.constant dense<0.000000e+00> : vector<8x128xf32>
    %91 = tpu.matmul %89, %90, %cst_53 {dimension_numbers = #tpu.dot_dimension_numbers<[1], [0], [0], [1], [0, 0, 1, 1], [], []>} : vector<8x128xbf16>, vector<128x128xbf16>, vector<8x128xf32> -> vector<8x128xf32>
    %c0_54 = arith.constant 0 : index
    %c0_55 = arith.constant 0 : index
    %92 = vector.load %arg21[%c0_54, %c0_55] : memref<1x128xf32, #tpu.memory_space<vmem>>, vector<1x128xf32>
    %93 = vector.broadcast %92 : vector<1x128xf32> to vector<8x128xf32>
    %94 = arith.addf %91, %93 : vector<8x128xf32>
    %c0_56 = arith.constant 0 : index
    %c0_57 = arith.constant 0 : index
    %95 = vector.load %arg5[%c0_56, %c0_57] : memref<8x8xf32, #tpu.memory_space<vmem>>, vector<8x8xf32>
    %96 = arith.truncf %95 : vector<8x8xf32> to vector<8x8xbf16>
    %97 = arith.truncf %39 : vector<8x128xf32> to vector<8x128xbf16>
    %cst_58 = arith.constant dense<0.000000e+00> : vector<8x128xf32>
    %98 = tpu.matmul %96, %97, %cst_58 {dimension_numbers = #tpu.dot_dimension_numbers<[1], [0], [0], [1], [0, 0, 1, 1], [], []>} : vector<8x8xbf16>, vector<8x128xbf16>, vector<8x128xf32> -> vector<8x128xf32>
    %99 = arith.addf %94, %98 : vector<8x128xf32>
    %cst_59 = arith.constant 0.000000e+00 : f32
    %100 = vector.broadcast %cst_59 : f32 to vector<8x128xf32>
    %101 = arith.maximumf %99, %100 : vector<8x128xf32>
    %c0_60 = arith.constant 0 : index
    %c0_61 = arith.constant 0 : index
    %102 = vector.load %arg22[%c0_60, %c0_61] : memref<128x256xf32, #tpu.memory_space<vmem>>, vector<128x256xf32>
    %103 = arith.truncf %101 : vector<8x128xf32> to vector<8x128xbf16>
    %104 = arith.truncf %102 : vector<128x256xf32> to vector<128x256xbf16>
    %cst_62 = arith.constant dense<0.000000e+00> : vector<8x256xf32>
    %105 = tpu.matmul %103, %104, %cst_62 {dimension_numbers = #tpu.dot_dimension_numbers<[1], [0], [0], [1], [0, 0, 1, 1], [], []>} : vector<8x128xbf16>, vector<128x256xbf16>, vector<8x256xf32> -> vector<8x256xf32>
    %c0_63 = arith.constant 0 : index
    %c0_64 = arith.constant 0 : index
    %106 = vector.load %arg23[%c0_63, %c0_64] : memref<1x256xf32, #tpu.memory_space<vmem>>, vector<1x256xf32>
    %107 = vector.broadcast %106 : vector<1x256xf32> to vector<8x256xf32>
    %108 = arith.addf %105, %107 : vector<8x256xf32>
    %c0_65 = arith.constant 0 : index
    %c0_66 = arith.constant 0 : index
    %109 = vector.load %arg26[%c0_65, %c0_66] : memref<8x256xf32, #tpu.memory_space<vmem>>, vector<8x256xf32>
    tpu.vector_store %arg26[%c0_65, %c0_66], %108 {strides = array<i32>} : memref<8x256xf32, #tpu.memory_space<vmem>>, vector<8x256xf32>,
    return
  }
  func.func @transform_0(%arg0: i32) -> (i32, i32) {
    %c0_i32 = arith.constant 0 : i32
    %c0_i32_0 = arith.constant 0 : i32
    return %arg0, %c0_i32 : i32, i32
  }
  func.func @transform_1(%arg0: i32) -> (i32, i32) {
    %c0_i32 = arith.constant 0 : i32
    %c0_i32_0 = arith.constant 0 : i32
    return %arg0, %c0_i32 : i32, i32
  }
  func.func @transform_2(%arg0: i32) -> (i32, i32) {
    %c0_i32 = arith.constant 0 : i32
    %c0_i32_0 = arith.constant 0 : i32
    return %arg0, %c0_i32 : i32, i32
  }
  func.func @transform_3(%arg0: i32) -> (i32, i32) {
    %c0_i32 = arith.constant 0 : i32
    %c0_i32_0 = arith.constant 0 : i32
    return %arg0, %c0_i32 : i32, i32
  }
  func.func @transform_4(%arg0: i32) -> (i32, i32) {
    %c0_i32 = arith.constant 0 : i32
    %c0_i32_0 = arith.constant 0 : i32
    return %arg0, %c0_i32 : i32, i32
  }
  func.func @transform_5(%arg0: i32) -> (i32, i32) {
    %c0_i32 = arith.constant 0 : i32
    %c0_i32_0 = arith.constant 0 : i32
    %c0_i32_1 = arith.constant 0 : i32
    return %c0_i32, %c0_i32_0 : i32, i32
  }
  func.func @transform_6(%arg0: i32) -> (i32, i32) {
    %c0_i32 = arith.constant 0 : i32
    %c0_i32_0 = arith.constant 0 : i32
    %c0_i32_1 = arith.constant 0 : i32
    return %c0_i32, %c0_i32_0 : i32, i32
  }
  func.func @transform_7(%arg0: i32) -> (i32, i32) {
    %c0_i32 = arith.constant 0 : i32
    %c0_i32_0 = arith.constant 0 : i32
    %c0_i32_1 = arith.constant 0 : i32
    return %c0_i32, %c0_i32_0 : i32, i32
  }
  func.func @transform_8(%arg0: i32) -> (i32, i32) {
    %c0_i32 = arith.constant 0 : i32
    %c0_i32_0 = arith.constant 0 : i32
    %c0_i32_1 = arith.constant 0 : i32
    return %c0_i32, %c0_i32_0 : i32, i32
  }
  func.func @transform_9(%arg0: i32) -> (i32, i32) {
    %c0_i32 = arith.constant 0 : i32
    %c0_i32_0 = arith.constant 0 : i32
    %c0_i32_1 = arith.constant 0 : i32
    return %c0_i32, %c0_i32_0 : i32, i32
  }
  func.func @transform_10(%arg0: i32) -> (i32, i32) {
    %c0_i32 = arith.constant 0 : i32
    %c0_i32_0 = arith.constant 0 : i32
    %c0_i32_1 = arith.constant 0 : i32
    return %c0_i32, %c0_i32_0 : i32, i32
  }
  func.func @transform_11(%arg0: i32) -> (i32, i32) {
    %c0_i32 = arith.constant 0 : i32
    %c0_i32_0 = arith.constant 0 : i32
    %c0_i32_1 = arith.constant 0 : i32
    return %c0_i32, %c0_i32_0 : i32, i32
  }
  func.func @transform_12(%arg0: i32) -> (i32, i32) {
    %c0_i32 = arith.constant 0 : i32
    %c0_i32_0 = arith.constant 0 : i32
    %c0_i32_1 = arith.constant 0 : i32
    return %c0_i32, %c0_i32_0 : i32, i32
  }
  func.func @transform_13(%arg0: i32) -> (i32, i32) {
    %c0_i32 = arith.constant 0 : i32
    %c0_i32_0 = arith.constant 0 : i32
    %c0_i32_1 = arith.constant 0 : i32
    return %c0_i32, %c0_i32_0 : i32, i32
  }
  func.func @transform_14(%arg0: i32) -> (i32, i32) {
    %c0_i32 = arith.constant 0 : i32
    %c0_i32_0 = arith.constant 0 : i32
    %c0_i32_1 = arith.constant 0 : i32
    return %c0_i32, %c0_i32_0 : i32, i32
  }
  func.func @transform_15(%arg0: i32) -> (i32, i32) {
    %c0_i32 = arith.constant 0 : i32
    %c0_i32_0 = arith.constant 0 : i32
    %c0_i32_1 = arith.constant 0 : i32
    return %c0_i32, %c0_i32_0 : i32, i32
  }
  func.func @transform_16(%arg0: i32) -> (i32, i32) {
    %c0_i32 = arith.constant 0 : i32
    %c0_i32_0 = arith.constant 0 : i32
    %c0_i32_1 = arith.constant 0 : i32
    return %c0_i32, %c0_i32_0 : i32, i32
  }
  func.func @transform_17(%arg0: i32) -> (i32, i32) {
    %c0_i32 = arith.constant 0 : i32
    %c0_i32_0 = arith.constant 0 : i32
    %c0_i32_1 = arith.constant 0 : i32
    return %c0_i32, %c0_i32_0 : i32, i32
  }
  func.func @transform_18(%arg0: i32) -> (i32, i32) {
    %c0_i32 = arith.constant 0 : i32
    %c0_i32_0 = arith.constant 0 : i32
    %c0_i32_1 = arith.constant 0 : i32
    return %c0_i32, %c0_i32_0 : i32, i32
  }
  func.func @transform_19(%arg0: i32) -> (i32, i32) {
    %c0_i32 = arith.constant 0 : i32
    %c0_i32_0 = arith.constant 0 : i32
    %c0_i32_1 = arith.constant 0 : i32
    return %c0_i32, %c0_i32_0 : i32, i32
  }
  func.func @transform_20(%arg0: i32) -> (i32, i32) {
    %c0_i32 = arith.constant 0 : i32
    %c0_i32_0 = arith.constant 0 : i32
    %c0_i32_1 = arith.constant 0 : i32
    return %c0_i32, %c0_i32_0 : i32, i32
  }
  func.func @transform_21(%arg0: i32) -> (i32, i32) {
    %c0_i32 = arith.constant 0 : i32
    %c0_i32_0 = arith.constant 0 : i32
    %c0_i32_1 = arith.constant 0 : i32
    return %c0_i32, %c0_i32_0 : i32, i32
  }
  func.func @transform_22(%arg0: i32) -> (i32, i32) {
    %c0_i32 = arith.constant 0 : i32
    %c0_i32_0 = arith.constant 0 : i32
    %c0_i32_1 = arith.constant 0 : i32
    return %c0_i32, %c0_i32_0 : i32, i32
  }
  func.func @transform_23(%arg0: i32) -> (i32, i32) {
    %c0_i32 = arith.constant 0 : i32
    %c0_i32_0 = arith.constant 0 : i32
    return %arg0, %c0_i32 : i32, i32
  }
  func.func @transform_24(%arg0: i32) -> (i32, i32) {
    %c0_i32 = arith.constant 0 : i32
    %c0_i32_0 = arith.constant 0 : i32
    return %arg0, %c0_i32 : i32, i32
  }
  func.func @transform_25(%arg0: i32) -> (i32, i32) {
    %c0_i32 = arith.constant 0 : i32
    %c0_i32_0 = arith.constant 0 : i32
    return %arg0, %c0_i32 : i32, i32
  }
}

</mosaic_0001>

<bundles_post_ra>
// kernel: tpu_custom_call.1
= control target key start
LH: loop header
LB: loop body
LE: loop exit
PB: predicated region body
PF: predicated region fallthrough
CT: control target
= control target key end

     0   :  { %s2009_s0 = inlined_call_operand.vmem [shape: s32[8,1], index: 0, kind: input, shape index: {}]   ;;  %s2010_s1 = inlined_call_operand.vmem [shape: f32[8,128], index: 1, kind: input, shape index: {}]   ;;  %s2011_s2 = inlined_call_operand.vmem [shape: f32[8,128], index: 2, kind: input, shape index: {}]   ;;  %s2012_s3 = inlined_call_operand.vmem [shape: f32[8,1], index: 3, kind: input, shape index: {}]   ;;  %s2013_s4 = inlined_call_operand.vmem [shape: f32[8,8], index: 4, kind: input, shape index: {}]   ;;  %s2014_s5 = inlined_call_operand.hbm [shape: f32[8,128], index: 5, kind: input, shape index: {}]   ;;  %s2015_s6 = inlined_call_operand.hbm [shape: f32[8,128], index: 6, kind: input, shape index: {}]   ;;  %s2016_s7 = inlined_call_operand.hbm [shape: f32[128,128], index: 7, kind: input, shape index: {}]   ;;  %s2017_s8 = inlined_call_operand.hbm [shape: f32[1,128], index: 8, kind: input, shape index: {}]   ;;  %s2018_s9 = inlined_call_operand.hbm [shape: f32[128,128], index: 9, kind: input, shape index: {}]   ;;  %s2019_s10 = inlined_call_operand.vmem [shape: f32[1,128], index: 10, kind: input, shape index: {}]   ;;  %s2020_s11 = inlined_call_operand.hbm [shape: f32[128,128], index: 11, kind: input, shape index: {}]   ;;  %s2021_s12 = inlined_call_operand.vmem [shape: f32[1,128], index: 12, kind: input, shape index: {}]   ;;  %s2022_s13 = inlined_call_operand.vmem [shape: f32[1,128], index: 13, kind: input, shape index: {}]   ;;  %s2023_s14 = inlined_call_operand.vmem [shape: f32[1,128], index: 14, kind: input, shape index: {}]   ;;  %s2024_s15 = inlined_call_operand.hbm [shape: f32[128,128], index: 15, kind: input, shape index: {}]   ;;  %s2025_s16 = inlined_call_operand.vmem [shape: f32[1,128], index: 16, kind: input, shape index: {}]   ;;  %s2026_s17 = inlined_call_operand.hbm [shape: f32[128,640], index: 17, kind: input, shape index: {}]   ;;  %s2027_s18 = inlined_call_operand.vmem [shape: f32[1,640], index: 18, kind: input, shape index: {}]   ;;  %s2028_s19 = inlined_call_operand.hbm [shape: f32[128,128], index: 19, kind: input, shape index: {}]   ;;  %s2029_s20 = inlined_call_operand.vmem [shape: f32[1,128], index: 20, kind: input, shape index: {}]   ;;  %s2030_s21 = inlined_call_operand.hbm [shape: f32[128,256], index: 21, kind: input, shape index: {}]   ;;  %s2031_s22 = inlined_call_operand.vmem [shape: f32[1,256], index: 22, kind: input, shape index: {}]   ;;  %s2032_s23 = inlined_call_operand.hbm [shape: f32[8,128], index: 23, kind: output, shape index: {0}]   ;;  %s2033_s24 = inlined_call_operand.hbm [shape: f32[8,640], index: 24, kind: output, shape index: {1}]   ;;  %s2034_s25 = inlined_call_operand.hbm [shape: f32[8,256], index: 25, kind: output, shape index: {2}]  }
   0x1   :  { %2035 = sst [smem:[#allocation31_spill]] %s2009_s0 }
   0x2   :  { %2036 = sst [smem:[#allocation32_spill]] %s2010_s1 }
   0x3   :  { %2037 = sst [smem:[#allocation33_spill]] %s2011_s2 }
   0x4   :  { %2038 = sst [smem:[#allocation34_spill]] %s2012_s3 }
   0x5   :  { %2039 = sst [smem:[#allocation35_spill]] %s2013_s4 }
   0x6   :  { %2040 = sst [smem:[#allocation36_spill]] %s2014_s5 }
   0x7   :  { %2041 = sst [smem:[#allocation37_spill]] %s2015_s6 }
   0x8   :  { %2042 = sst [smem:[#allocation38_spill]] %s2016_s7 }
   0x9   :  { %2043 = sst [smem:[#allocation39_spill]] %s2017_s8 }
   0xa   :  { %2044 = sst [smem:[#allocation40_spill]] %s2018_s9 }
   0xb   :  { %31 = vsyncpa [#allocation3], 0 }
   0xc   :  { %32 = vsyncpa [#allocation6], 0 }
   0xd   :  { %33 = vsyncpa [#allocation9], 0 }
   0xe   :  { %34 = vsyncpa [#allocation12], 0 }
   0xf   :  { %35 = vsyncpa [#allocation15], 0 }
  0x10   :  { %36 = vsyncpa [#allocation18], 0 }
  0x11   :  { %37 = vsyncpa [#allocation4], 0 }
  0x12   :  { %38 = vsyncpa [#allocation21], 0  ;;  %s1654_s29 = smov [#allocation5]   ;;  %s1655_s6 = smov [#allocation8]  }
  0x13   :  { %s65_s2 = sshll.u32 %s1654_s29, 4  ;;  %s87_s30 = sshll.u32 %s1655_s6, 4  ;;  %s66_s2 = int_to_ptr.vmem [resolvable:$true] %s65_s2  ;;  %s88_s30 = int_to_ptr.vmem [resolvable:$true] %s87_s30 }
  0x14   :  { %s1386_s7 = scalar_lea.vmem %s66_s2, 128  ;;  %p1391_p1 = scmp.lt.s32.totalorder %s66_s2, %s66_s2 }
  0x15   :  { %p1387_p0 = scmp.ne.s32.totalorder %s66_s2, %s1386_s7  ;;  %p1392_p2 = scmp.lt.s32.totalorder %s1386_s7, %s1386_s7 }
  0x17   :  { %p1393_p3 = por %p1392_p2, %p1391_p1 }
  0x19   :  { %p1394_p4 = pnand %p1393_p3, %p1387_p0 }
  0x1b   :  { %1397 = shalt.err (!%p1394_p4)
}
  0x1c   :  { %s2045_s1 = sld [smem:[#allocation37_spill]]  ;;  %s1406_s8 = scalar_lea.vmem %s88_s30, 16 }
  0x1d   :  { %p1407_p5 = scmp.ne.s32.totalorder %s88_s30, %s1406_s8  ;;  %s1410_s27 = scalar_lea.vmem %s88_s30, 32 }
  0x1e   :  { %p1411_p6 = scmp.lt.s32.totalorder %s88_s30, %s88_s30  ;;  %p1412_p7 = scmp.lt.s32.totalorder %s1410_s27, %s1406_s8 }
  0x20   :  { %p1413_p8 = por %p1412_p7, %p1411_p6 }
  0x22   :  { %68 = dma.hbm_to_vmem [thread:$0]  %s2045_s1, 128, %s66_s2, [#allocation6]  }
  0x23   :  { %p1414_p9 = pnand %p1413_p8, %p1407_p5 }
  0x25   :  { %1417 = shalt.err (!%p1414_p9)
}
  0x26   :  { %s2046_s9 = sld [smem:[#allocation39_spill]]  ;;  %s1656_s5 = smov [#allocation11]  }
  0x27   :  { %s110_s0 = sshll.u32 %s1656_s5, 4  ;;  %s1657_s29 = smov [#allocation14]   ;;  %s111_s0 = int_to_ptr.vmem [resolvable:$true] %s110_s0 }
  0x28   :  { %s142_s6 = sshll.u32 %s1657_s29, 4  ;;  %s1426_s7 = scalar_lea.vmem %s111_s0, 2048  ;;  %s143_s6 = int_to_ptr.vmem [resolvable:$true] %s142_s6 }
  0x29   :  { %p1427_p10 = scmp.ne.s32.totalorder %s111_s0, %s1426_s7  ;;  %p1431_p11 = scmp.lt.s32.totalorder %s111_s0, %s111_s0 }
  0x2a   :  { %p1432_p12 = scmp.lt.s32.totalorder %s1426_s7, %s1426_s7 }
  0x2c   :  { %90 = dma.hbm_to_vmem [thread:$0]  %s2046_s9, 16, %s88_s30, [#allocation9]  }
  0x2d   :  { %p1433_p13 = por %p1432_p12, %p1431_p11 }
  0x2f   :  { %p1434_p0 = pnand %p1433_p13, %p1427_p10 }
  0x31   :  { %1437 = shalt.err (!%p1434_p0)
}
  0x32   :  { %s1658_s2 = smov 128   ;;  %s1659_s3 = smov 8  }
  0x33   :  { %116 = dma.hbm_to_vmem [thread:$0]  %s2020_s11, 2048, %s111_s0, [#allocation12], %s1658_s2, %s1658_s2, %s1659_s3  }
  0x34   :  { %s1446_s1 = scalar_lea.vmem %s143_s6, 10240  ;;  %p1451_p2 = scmp.lt.s32.totalorder %s143_s6, %s143_s6 }
  0x35   :  { %p1447_p1 = scmp.ne.s32.totalorder %s143_s6, %s1446_s1  ;;  %p1452_p3 = scmp.lt.s32.totalorder %s1446_s1, %s1446_s1 }
  0x37   :  { %p1453_p4 = por %p1452_p3, %p1451_p2 }
  0x39   :  { %p1454_p5 = pnand %p1453_p4, %p1447_p1 }
  0x3b   :  { %1457 = shalt.err (!%p1454_p5)
}
  0x3c   :  { %s1660_s8 = smov 640   ;;  %s1661_s27 = smov 40  }
  0x3d   :  { %148 = dma.hbm_to_vmem [thread:$0]  %s2026_s17, 10240, %s143_s6, [#allocation15], %s1660_s8, %s1660_s8, %s1661_s27  }
  0x3e   :  { %s1662_s9 = smov [#allocation2]   ;;  %s1663_s29 = smov [#allocation7]  }
  0x3f   :  { %s55_s5 = sshll.u32 %s1662_s9, 4  ;;  %s74_s7 = sshll.u32 %s1663_s29, 4  ;;  %s56_s5 = int_to_ptr.vmem [resolvable:$true] %s55_s5  ;;  %s75_s7 = int_to_ptr.vmem [resolvable:$true] %s74_s7 }
  0x40   :  { %s1466_s11 = scalar_lea.vmem %s56_s5, 128  ;;  %p1471_p7 = scmp.lt.s32.totalorder %s56_s5, %s56_s5 }
  0x41   :  { %p1467_p6 = scmp.ne.s32.totalorder %s56_s5, %s1466_s11  ;;  %p1472_p8 = scmp.lt.s32.totalorder %s1466_s11, %s1466_s11 }
  0x43   :  { %p1473_p9 = por %p1472_p8, %p1471_p7 }
  0x45   :  { %p1474_p10 = pnand %p1473_p9, %p1467_p6 }
  0x47   :  { %1477 = shalt.err (!%p1474_p10)
}
  0x48   :  { %s2047_s30 = sld [smem:[#allocation36_spill]]  ;;  %s1486_s1 = scalar_lea.vmem %s75_s7, 2048 }
  0x49   :  { %p1487_p11 = scmp.ne.s32.totalorder %s75_s7, %s1486_s1  ;;  %p1491_p12 = scmp.lt.s32.totalorder %s75_s7, %s75_s7 }
  0x4a   :  { %p1492_p13 = scmp.lt.s32.totalorder %s1486_s1, %s1486_s1 }
  0x4c   :  { %p1493_p0 = por %p1492_p13, %p1491_p12 }
  0x4e   :  { %58 = dma.hbm_to_vmem [thread:$0]  %s2047_s30, 128, %s56_s5, [#allocation3]  }
  0x4f   :  { %p1494_p1 = pnand %p1493_p0, %p1487_p11 }
  0x51   :  { %1497 = shalt.err (!%p1494_p1)
}
  0x52   :  { %s2048_s8 = sld [smem:[#allocation38_spill]]  ;;  %s1664_s27 = smov [#allocation10]  }
  0x53   :  { %s96_s4 = sshll.u32 %s1664_s27, 4  ;;  %s1665_s28 = smov [#allocation13]   ;;  %s97_s4 = int_to_ptr.vmem [resolvable:$true] %s96_s4 }
  0x54   :  { %s128_s9 = sshll.u32 %s1665_s28, 4  ;;  %s1506_s5 = scalar_lea.vmem %s97_s4, 2048  ;;  %s129_s9 = int_to_ptr.vmem [resolvable:$true] %s128_s9 }
  0x55   :  { %p1507_p2 = scmp.ne.s32.totalorder %s97_s4, %s1506_s5  ;;  %p1511_p3 = scmp.lt.s32.totalorder %s97_s4, %s97_s4 }
  0x56   :  { %p1512_p4 = scmp.lt.s32.totalorder %s1506_s5, %s1506_s5 }
  0x58   :  { %80 = dma.hbm_to_vmem [thread:$0]  %s2048_s8, 2048, %s75_s7, [#allocation6], %s1658_s2, %s1658_s2, %s1659_s3  }
  0x59   :  { %p1513_p5 = por %p1512_p4, %p1511_p3 }
  0x5b   :  { %p1514_p6 = pnand %p1513_p5, %p1507_p2 }
  0x5d   :  { %1517 = shalt.err (!%p1514_p6)
}
  0x5e   :  { %s2049_s0 = sld [smem:[#allocation40_spill]]  ;;  %s1526_s7 = scalar_lea.vmem %s129_s9, 2048 }
  0x5f   :  { %p1527_p7 = scmp.ne.s32.totalorder %s129_s9, %s1526_s7  ;;  %p1531_p8 = scmp.lt.s32.totalorder %s129_s9, %s129_s9 }
  0x60   :  { %p1532_p9 = scmp.lt.s32.totalorder %s1526_s7, %s1526_s7 }
  0x62   :  { %p1533_p10 = por %p1532_p9, %p1531_p8 }
  0x64   :  { %102 = dma.hbm_to_vmem [thread:$0]  %s2049_s0, 2048, %s97_s4, [#allocation9], %s1658_s2, %s1658_s2, %s1659_s3  }
  0x65   :  { %p1534_p11 = pnand %p1533_p10, %p1527_p7 }
  0x67   :  { %1537 = shalt.err (!%p1534_p11)
}
  0x68   :  { %134 = dma.hbm_to_vmem [thread:$0]  %s2024_s15, 2048, %s129_s9, [#allocation12], %s1658_s2, %s1658_s2, %s1659_s3  }
  0x69   :  { %s1666_s1 = smov [#allocation16]   ;;  %s1667_s6 = smov [#allocation17]  }
  0x6a   :  { %s156_s17 = sshll.u32 %s1666_s1, 4  ;;  %s170_s8 = sshll.u32 %s1667_s6, 4  ;;  %s157_s17 = int_to_ptr.vmem [resolvable:$true] %s156_s17  ;;  %s171_s8 = int_to_ptr.vmem [resolvable:$true] %s170_s8 }
  0x6b   :  { %s1546_s27 = scalar_lea.vmem %s157_s17, 2048  ;;  %p1551_p13 = scmp.lt.s32.totalorder %s157_s17, %s157_s17 }
  0x6c   :  { %p1547_p12 = scmp.ne.s32.totalorder %s157_s17, %s1546_s27  ;;  %p1552_p0 = scmp.lt.s32.totalorder %s1546_s27, %s1546_s27 }
  0x6e   :  { %p1553_p1 = por %p1552_p0, %p1551_p13 }
  0x70   :  { %p1554_p2 = pnand %p1553_p1, %p1547_p12 }
  0x72   :  { %1557 = shalt.err (!%p1554_p2)
}
  0x73   :  { %162 = dma.hbm_to_vmem [thread:$0]  %s2028_s19, 2048, %s157_s17, [#allocation15], %s1658_s2, %s1658_s2, %s1659_s3  }
  0x74   :  { %s1566_s15 = scalar_lea.vmem %s171_s8, 4096  ;;  %p1571_p4 = scmp.lt.s32.totalorder %s171_s8, %s171_s8 }
  0x75   :  { %p1567_p3 = scmp.ne.s32.totalorder %s171_s8, %s1566_s15  ;;  %p1572_p5 = scmp.lt.s32.totalorder %s1566_s15, %s1566_s15 }
  0x77   :  { %p1573_p6 = por %p1572_p5, %p1571_p4 }
  0x79   :  { %p1574_p7 = pnand %p1573_p6, %p1567_p3 }
  0x7b   :  { %1577 = shalt.err (!%p1574_p7)
}
  0x7c   :  { %s1668_s9 = smov 256   ;;  %s1669_s5 = smov 16  }
  0x7d   :  { %176 = dma.hbm_to_vmem [thread:$0]  %s2030_s21, 4096, %s171_s8, [#allocation18], %s1668_s9, %s1668_s9, %s1669_s5  }
  0x7e   :  { %1638 = dma.done.wait [#allocation3], 128  }
  0x7f   :  { %1639 = vsyncadd [#allocation3], 4294967168 }
  0x80   :  { %1640 = dma.done.wait [#allocation6], 2176  }
  0x81   :  { %1641 = vsyncadd [#allocation6], 4294965120 }
  0x82   :  { %1642 = dma.done.wait [#allocation9], 2064  }
  0x83   :  { %1643 = vsyncadd [#allocation9], 4294965232 }
  0x84   :  { %1644 = dma.done.wait [#allocation12], 4096  }
  0x85   :  { %1645 = vsyncadd [#allocation12], 4294963200 }
  0x86   :  { %1646 = dma.done.wait [#allocation15], 12288  }
  0x87   :  { %1647 = vsyncadd [#allocation15], 4294955008 }
  0x88   :  { %1648 = dma.done.wait [#allocation18], 4096  }
  0x89   :  { %1649 = vsyncadd [#allocation18], 4294963200  ;;  %v1670_v0 = vmov 0   ;;  %v1671_v1 = vmov 0.0   ;;  %vm1672_vm0 = vmmov 0   ;;  %s2050_s2 = sld [smem:[#allocation31_spill]] }
  0x8a   :  { %1375 = vset.pattern.permute.xlu0 %v1670_v0  ;;  %1221 = vmatprep.subr.bf16.mxu0 %v1671_v1  ;;  %v239_v3 = vld [vmem:[#allocation7 + $0x70] sm:$0xff]  ;;  %v240_v4 = vld [vmem:[#allocation7 + $0x78] sm:$0xff]  ;;  %v237_v6 = vld [vmem:[#allocation7 + $0x60] sm:$0xff]  ;;  %s2051_s7 = sld [smem:[#allocation34_spill]]  ;;  %vm454_vm1 = vcmask 1043456   ;;  %vm450_vm3 = vcmask 64512  }
  0x8b   :  { %1237 = vmatprep.mubr.msk.bf16.mxu0 %vm1672_vm0, %v1671_v1  ;;  %1241 = vmatprep.subr.bf16.mxu1 %v1671_v1  ;;  %v249_v5 = vpack.c.bf16 %v240_v4, %v239_v3  ;;  %v238_v7 = vld [vmem:[#allocation7 + $0x68] sm:$0xff]  ;;  %v235_v10 = vld [vmem:[#allocation7 + $0x50] sm:$0xff]  ;;  %v236_v11 = vld [vmem:[#allocation7 + $0x58] sm:$0xff]  ;;  %s2052_s1 = sld [smem:[#allocation32_spill]]  ;;  %s1673_s3 = smov [#allocation20]  }
  0x8c   :  { %1257 = vmatprep.mubr.msk.bf16.mxu1 %vm1672_vm0, %v1671_v1  ;;  %v248_v9 = vpack.c.bf16 %v238_v7, %v237_v6  ;;  %v319_v12 = vld [vmem:[#allocation10 + $0x70] sm:$0xff]  ;;  %v247_v13 = vpack.c.bf16 %v236_v11, %v235_v10  ;;  %v320_v14 = vld [vmem:[#allocation10 + $0x78] sm:$0xff]  ;;  %v317_v15 = vld [vmem:[#allocation10 + $0x60] sm:$0xff]  ;;  %s2053_s8 = sld [smem:[#allocation33_spill]]  ;;  %s1121_s0 = sshll.u32 %s1673_s3, 4  ;;  %s1122_s0 = int_to_ptr.vmem [resolvable:$true] %s1121_s0 }
  0x8d   :  { %1222 = vmatpush3.bf16.msra.mxu0 %v249_v5  ;;  %v318_v16 = vld [vmem:[#allocation10 + $0x68] sm:$0xff]  ;;  %v233_v17 = vld [vmem:[#allocation7 + $0x40] sm:$0xff]  ;;  %v329_v19 = vpack.c.bf16 %v320_v14, %v319_v12  ;;  %v315_v22 = vld [vmem:[#allocation10 + $0x50] sm:$0xff]  ;;  %s2054_s11 = sld [smem:[#allocation35_spill]]  ;;  %s1578_s30 = scalar_lea.vmem %s1122_s0, 640 }
  0x8e   :  { %1223 = vmatprep.subr.bf16.mxu0 %v1671_v1  ;;  %v234_v18 = vld [vmem:[#allocation7 + $0x48] sm:$0xff]  ;;  %v328_v20 = vpack.c.bf16 %v318_v16, %v317_v15  ;;  %v316_v23 = vld [vmem:[#allocation10 + $0x58] sm:$0xff]  ;;  %v231_v24 = vld [vmem:[#allocation7 + $0x30] sm:$0xff]  ;;  %v211_v16 = vlaneseq  ;;  %p1579_p8 = scmp.ne.s32.totalorder %s1122_s0, %s1578_s30  ;;  %p1583_p9 = scmp.lt.s32.totalorder %s1122_s0, %s1122_s0 }
  0x8f   :  { %v210_v2 = vld [vmem:[%s2050_s2] sm:$0xff]  ;;  %1242 = vmatpush3.bf16.msra.mxu1 %v329_v19  ;;  %v246_v21 = vpack.c.bf16 %v234_v18, %v233_v17  ;;  %v232_v25 = vld [vmem:[#allocation7 + $0x38] sm:$0xff]  ;;  %v327_v26 = vpack.c.bf16 %v316_v23, %v315_v22  ;;  %v313_v28 = vld [vmem:[#allocation10 + $0x40] sm:$0xff]  ;;  %p1584_p10 = scmp.lt.s32.totalorder %s1578_s30, %s1578_s30 }
  0x90   :  { %214 = vperm.xlu0 %1375, %v210_v2   ;;  %v297_v8 = vld [vmem:[%s2051_s7] sm:$0xff]  ;;  %1243 = vmatprep.subr.bf16.mxu1 %v1671_v1  ;;  %v245_v27 = vpack.c.bf16 %v232_v25, %v231_v24  ;;  %v229_v30 = vld [vmem:[#allocation7 + $0x20] sm:$0xff]  ;;  %v230_v31 = vld [vmem:[#allocation7 + $0x28] sm:$0xff]  ;;  %s1674_s7 = smov [#allocation19]  }
  0x91   :  { %1224 = vmatpush3.bf16.msra.mxu0 %v248_v9  ;;  %v314_v29 = vld [vmem:[#allocation10 + $0x48] sm:$0xff]  ;;  %v244_v33 = vpack.c.bf16 %v230_v31, %v229_v30  ;;  %v311_v34 = vld [vmem:[#allocation10 + $0x30] sm:$0xff]  ;;  %v312_v35 = vld [vmem:[#allocation10 + $0x38] sm:$0xff]  ;;  %s1111_s26 = sshll.u32 %s1674_s7, 4  ;;  %p1585_p11 = por %p1584_p10, %p1583_p9  ;;  %s1112_s26 = int_to_ptr.vmem [resolvable:$true] %s1111_s26 }
  0x92   :  { %1225 = vmatprep.subr.bf16.mxu0 %v1671_v1  ;;  %v326_v32 = vpack.c.bf16 %v314_v29, %v313_v28  ;;  %v227_v36 = vld [vmem:[#allocation7 + $0x10] sm:$0xff]  ;;  %v228_v37 = vld [vmem:[#allocation7 + $0x18] sm:$0xff]  ;;  %v325_v39 = vpack.c.bf16 %v312_v35, %v311_v34  ;;  %v309_v42 = vld [vmem:[#allocation10 + $0x20] sm:$0xff] }
  0x93   :  { %1244 = vmatpush3.bf16.msra.mxu1 %v328_v20  ;;  %v222_v38 = vld [vmem:[%s2052_s1] sm:$0xff]  ;;  %v243_v40 = vpack.c.bf16 %v228_v37, %v227_v36  ;;  %v225_v44 = vld [vmem:[#allocation7] sm:$0xff]  ;;  %v226_v45 = vld [vmem:[#allocation7 + $0x8] sm:$0xff]  ;;  %v212_v20 = vand.u32 127, %v211_v16  ;;  %p1586_p12 = pnand %p1585_p11, %p1579_p8 }
  0x94   :  { %300 = vperm.xlu0 %1375, %v297_v8   ;;  %1245 = vmatprep.subr.bf16.mxu1 %v1671_v1  ;;  %v223_v41 = vld [vmem:[%s2053_s8] sm:$0xff]  ;;  %v242_v48 = vpack.c.bf16 %v226_v45, %v225_v44  ;;  %v308_v50 = vld [vmem:[#allocation10 + $0x18] sm:$0xff]  ;;  %v305_v53 = vld [vmem:[#allocation10] sm:$0xff] }
  0x95   :  { %1226 = vmatpush3.bf16.msra.mxu0 %v247_v13  ;;  %v310_v43 = vld [vmem:[#allocation10 + $0x28] sm:$0xff]  ;;  %v224_v46 = vmul.f32 %v223_v41, %v222_v38  ;;  %v307_v49 = vld [vmem:[#allocation10 + $0x10] sm:$0xff]  ;;  %v393_v62 = vld [vmem:[#allocation11 + $0x78] sm:$0xff]  ;;  %vm498_vm4 = vcmp.lt.s32.totalorder %v212_v20, 32 }
  0x96   :  { %1227 = vmatprep.subr.bf16.mxu0 %v1671_v1  ;;  %v324_v47 = vpack.c.bf16 %v310_v43, %v309_v42  ;;  %v323_v52 = vpack.c.bf16 %v308_v50, %v307_v49  ;;  %v306_v54 = vld [vmem:[#allocation10 + $0x8] sm:$0xff]  ;;  %v217_v55 = vld [vmem:[#allocation5] sm:$0xff]  ;;  %v390_v63 = vld [vmem:[#allocation11 + $0x60] sm:$0xff]  ;;  %v1157_v45 = vsel %vm498_vm4, 1.0, %v1671_v1 }
  0x97   :  { %1246 = vmatpush3.bf16.msra.mxu1 %v327_v26  ;;  %v241_v51 = vpack.c.bf16 %v224_v46, %v224_v46  ;;  %v322_v56 = vpack.c.bf16 %v306_v54, %v305_v53  ;;  %v304_v57 = vld [vmem:[#allocation2] sm:$0xff]  ;;  %v221_v58 = vpack.c.bf16 %v217_v55, %v217_v55  ;;  %v389_v6 = vld [vmem:[#allocation11 + $0x58] sm:$0xff]  ;;  %v386_v8 = vld [vmem:[#allocation11 + $0x40] sm:$0xff] }
  0x98   :  { %1247 = vmatprep.subr.bf16.mxu1 %v1671_v1  ;;  %v321_v59 = vpack.c.bf16 %v304_v57, %v304_v57  ;;  %v392_v61 = vld [vmem:[#allocation11 + $0x70] sm:$0xff]  ;;  %v391_v3 = vld [vmem:[#allocation11 + $0x68] sm:$0xff]  ;;  %v385_v12 = vld [vmem:[#allocation11 + $0x38] sm:$0xff] }
  0x99   :  { %1228 = vmatpush3.bf16.msra.mxu0 %v246_v21  ;;  %v456_v60 = vsel %vm454_vm1, %v221_v58, 0  ;;  %v402_v2 = vpack.c.bf16 %v393_v62, %v392_v61  ;;  %v401_v4 = vpack.c.bf16 %v391_v3, %v390_v63  ;;  %v388_v5 = vld [vmem:[#allocation11 + $0x50] sm:$0xff]  ;;  %v387_v9 = vld [vmem:[#allocation11 + $0x48] sm:$0xff]  ;;  %v382_v14 = vld [vmem:[#allocation11 + $0x20] sm:$0xff] }
  0x9a   :  { %1229 = vmatprep.subr.bf16.mxu0 %v1671_v1  ;;  %v400_v7 = vpack.c.bf16 %v389_v6, %v388_v5  ;;  %v399_v10 = vpack.c.bf16 %v387_v9, %v386_v8  ;;  %v384_v11 = vld [vmem:[#allocation11 + $0x30] sm:$0xff]  ;;  %v383_v15 = vld [vmem:[#allocation11 + $0x28] sm:$0xff]  ;;  %v381_v19 = vld [vmem:[#allocation11 + $0x18] sm:$0xff] }
  0x9b   :  { %1248 = vmatpush3.bf16.msra.mxu1 %v326_v32  ;;  %v398_v13 = vpack.c.bf16 %v385_v12, %v384_v11  ;;  %v397_v17 = vpack.c.bf16 %v383_v15, %v382_v14  ;;  %v380_v18 = vld [vmem:[#allocation11 + $0x10] sm:$0xff]  ;;  %v378_v22 = vld [vmem:[#allocation11] sm:$0xff]  ;;  %v379_v23 = vld [vmem:[#allocation11 + $0x8] sm:$0xff] }
  0x9c   :  { %1249 = vmatprep.subr.bf16.mxu1 %v1671_v1  ;;  %v396_v21 = vpack.c.bf16 %v381_v19, %v380_v18  ;;  %v395_v26 = vpack.c.bf16 %v379_v23, %v378_v22  ;;  %v1154_v31 = vld [vmem:[%s2019_s10] ss:$0 sm:$0xff]  ;;  %v543_v54 = vld [vmem:[#allocation13 + $0x60] sm:$0xff]  ;;  %v542_v5 = vld [vmem:[#allocation13 + $0x58] sm:$0xff] }
  0x9d   :  { %1230 = vmatpush3.bf16.msra.mxu0 %v245_v27  ;;  %v544_v55 = vld [vmem:[#allocation13 + $0x68] sm:$0xff]  ;;  %v537_v9 = vld [vmem:[#allocation13 + $0x30] sm:$0xff]  ;;  %v538_v11 = vld [vmem:[#allocation13 + $0x38] sm:$0xff] }
  0x9e   :  { %1231 = vmatprep.subr.bf16.mxu0 %v1671_v1  ;;  %v540_v8 = vld [vmem:[#allocation13 + $0x48] sm:$0xff]  ;;  %v551_v12 = vpack.c.bf16 %v538_v11, %v537_v9  ;;  %v534_v18 = vld [vmem:[#allocation13 + $0x18] sm:$0xff] }
  0x9f   :  { %1250 = vmatpush3.bf16.msra.mxu1 %v325_v39  ;;  %v536_v14 = vld [vmem:[#allocation13 + $0x28] sm:$0xff]  ;;  %v675_v23 = vld [vmem:[#allocation14 + $0x238] sm:$0xff] }
  0xa0   :  { %1251 = vmatprep.subr.bf16.mxu1 %v1671_v1 }
  0xa1   :  { %1232 = vmatpush3.bf16.msra.mxu0 %v244_v33 }
  0xa2   :  { %1233 = vmatprep.subr.bf16.mxu0 %v1671_v1 }
  0xa3   :  { %1252 = vmatpush3.bf16.msra.mxu1 %v324_v47 }
  0xa4   :  { %1253 = vmatprep.subr.bf16.mxu1 %v1671_v1 }
  0xa5   :  { %1234 = vmatpush3.bf16.msra.mxu0 %v243_v40  ;;  %v1153_v40 = vld [vmem:[#allocation8] ss:$0 sm:$0xff] }
  0xa6   :  { %1235 = vmatprep.subr.bf16.mxu0 %v1671_v1 }
  0xa7   :  { %1254 = vmatpush3.bf16.msra.mxu1 %v323_v52  ;;  %v546_v52 = vld [vmem:[#allocation13 + $0x78] sm:$0xff] }
  0xa8   :  { %1255 = vmatprep.subr.bf16.mxu1 %v1671_v1 }
  0xa9   :  { %1236 = vmatpush3.bf16.msra.mxu0 %v242_v48 }
  0xaa   :  { %1261 = vmatprep.subr.bf16.mxu0 %v1671_v1 }
  0xab   :  { %1256 = vmatpush3.bf16.msra.mxu1 %v322_v56  ;;  %v554_v56 = vpack.c.bf16 %v544_v55, %v543_v54  ;;  %v639_v54 = vld [vmem:[#allocation14 + $0x118] sm:$0xff] }
  0xac   :  { %1238 = vmatmul.mubr.bf16.vlgmr.msra.gmra.mxu0 %v241_v51  ;;  %1281 = vmatprep.subr.bf16.mxu1 %v1671_v1  ;;  %v545_v51 = vld [vmem:[#allocation13 + $0x70] sm:$0xff] }
  0xad   :  { %1277 = vmatprep.mubr.msk.bf16.mxu0 %vm1672_vm0, %v1671_v1  ;;  %1262 = vmatpush3.bf16.msra.mxu0 %v402_v2  ;;  %v555_v53 = vpack.c.bf16 %v546_v52, %v545_v51  ;;  %v640_v51 = vld [vmem:[#allocation14 + $0x120] sm:$0xff] }
  0xae   :  { %1258 = vmatmul.mubr.bf16.vlgmr.msra.gmra.mxu1 %v321_v59  ;;  %1263 = vmatprep.subr.bf16.mxu0 %v1671_v1 }
  0xaf   :  { %1282 = vmatpush3.bf16.msra.mxu1 %v456_v60  ;;  %1283 = vmatprep.mubr.msk.bf16.mxu1 %vm1672_vm0, %v1671_v1 }
  0xb0   :  { %1287 = vmatprep.subr.bf16.mxu1 %v1671_v1 }
  0xb1   :  { %1264 = vmatpush3.bf16.msra.mxu0 %v401_v4  ;;  %v541_v4 = vld [vmem:[#allocation13 + $0x50] sm:$0xff] }
  0xb2   :  { %1265 = vmatprep.subr.bf16.mxu0 %v1671_v1  ;;  %v553_v6 = vpack.c.bf16 %v542_v5, %v541_v4  ;;  %v614_v5 = vld [vmem:[#allocation14 + $0x50] sm:$0xff] }
  0xb5   :  { %1266 = vmatpush3.bf16.msra.mxu0 %v400_v7  ;;  %v539_v7 = vld [vmem:[#allocation13 + $0x40] sm:$0xff] }
  0xb6   :  { %1267 = vmatprep.subr.bf16.mxu0 %v1671_v1 }
  0xb9   :  { %1268 = vmatpush3.bf16.msra.mxu0 %v399_v10  ;;  %v552_v10 = vpack.c.bf16 %v540_v8, %v539_v7 }
  0xba   :  { %1269 = vmatprep.subr.bf16.mxu0 %v1671_v1 }
  0xbd   :  { %1270 = vmatpush3.bf16.msra.mxu0 %v398_v13  ;;  %v535_v13 = vld [vmem:[#allocation13 + $0x20] sm:$0xff] }
  0xbe   :  { %1271 = vmatprep.subr.bf16.mxu0 %v1671_v1  ;;  %v550_v15 = vpack.c.bf16 %v536_v14, %v535_v13  ;;  %v1159_v14 = vld [vmem:[%s2023_s14] ss:$0 sm:$0xff] }
  0xc1   :  { %1272 = vmatpush3.bf16.msra.mxu0 %v397_v17  ;;  %v533_v17 = vld [vmem:[#allocation13 + $0x10] sm:$0xff] }
  0xc2   :  { %1273 = vmatprep.subr.bf16.mxu0 %v1671_v1  ;;  %v549_v19 = vpack.c.bf16 %v534_v18, %v533_v17  ;;  %v676_v17 = vld [vmem:[#allocation14 + $0x240] sm:$0xff]  ;;  %v681_v18 = vld [vmem:[#allocation14 + $0x268] sm:$0xff] }
  0xc5   :  { %1274 = vmatpush3.bf16.msra.mxu0 %v396_v21  ;;  %v532_v21 = vld [vmem:[#allocation13 + $0x8] sm:$0xff] }
  0xc6   :  { %1275 = vmatprep.subr.bf16.mxu0 %v1671_v1 }
  0xc9   :  { %1276 = vmatpush3.bf16.msra.mxu0 %v395_v26 }
 0x10b   :  { %v215_v24 = vpop.permute.xlu0 %214 }
 0x10c   :  { %vm216_vm2 = vcmp.eq.s32.totalorder %v212_v20, %v215_v24  ;;  %v531_v20 = vld [vmem:[#allocation13] sm:$0xff] }
 0x10d   :  { %v1152_v25 = vsel %vm216_vm2, 1.0, %v1671_v1  ;;  %v548_v22 = vpack.c.bf16 %v532_v21, %v531_v20  ;;  %v680_v24 = vld [vmem:[#allocation14 + $0x260] sm:$0xff] }
 0x10e   :  { %v220_v27 = vpack.c.bf16 %v1152_v25, %v1152_v25  ;;  %v677_v25 = vld [vmem:[#allocation14 + $0x248] sm:$0xff]  ;;  %v721_v26 = vpack.c.bf16 %v680_v24, %v675_v23  ;;  %v672_v20 = vld [vmem:[#allocation14 + $0x220] sm:$0xff] }
 0x10f   :  { %v301_v42 = vpop.permute.xlu0 %300 }
 0x110   :  { %1284 = vmatmul.mubr.msk.bf16.vlgmr.msra.gmra.mxu1 %vm450_vm3, %v220_v27  ;;  %v682_v27 = vld [vmem:[#allocation14 + $0x270] sm:$0xff]  ;;  %752 = vmatprep.subr.bf16.mxu0 %v721_v26  ;;  %v671_v26 = vld [vmem:[#allocation14 + $0x218] sm:$0xff] }
 0x111   :  { %1303 = vmatprep.mubr.msk.bf16.mxu1 %vm1672_vm0, %v1671_v1  ;;  %1288 = vmatpush3.bf16.msra.mxu1 %v555_v53  ;;  %v634_v53 = vld [vmem:[#allocation14 + $0xf0] sm:$0xff] }
 0x112   :  { %1289 = vmatprep.subr.bf16.mxu1 %v1671_v1  ;;  %v700_v55 = vpack.c.bf16 %v639_v54, %v634_v53  ;;  %v616_v54 = vld [vmem:[#allocation14 + $0x60] sm:$0xff] }
 0x115   :  { %1290 = vmatpush3.bf16.msra.mxu1 %v554_v56  ;;  %v625_v56 = vld [vmem:[#allocation14 + $0xa8] sm:$0xff] }
 0x116   :  { %1291 = vmatprep.subr.bf16.mxu1 %v1671_v1 }
 0x119   :  { %1292 = vmatpush3.bf16.msra.mxu1 %v553_v6  ;;  %v619_v6 = vld [vmem:[#allocation14 + $0x78] sm:$0xff] }
 0x11a   :  { %1293 = vmatprep.subr.bf16.mxu1 %v1671_v1  ;;  %v690_v7 = vpack.c.bf16 %v619_v6, %v614_v5  ;;  %v606_v6 = vld [vmem:[#allocation14 + $0x10] sm:$0xff] }
 0x11d   :  { %1294 = vmatpush3.bf16.msra.mxu1 %v552_v10 }
 0x11e   :  { %1295 = vmatprep.subr.bf16.mxu1 %v1671_v1 }
 0x121   :  { %1296 = vmatpush3.bf16.msra.mxu1 %v551_v12  ;;  %v1158_v12 = vld [vmem:[%s2022_s13] ss:$0 sm:$0xff] }
 0x122   :  { %1297 = vmatprep.subr.bf16.mxu1 %v1671_v1 }
 0x125   :  { %1298 = vmatpush3.bf16.msra.mxu1 %v550_v15 }
 0x126   :  { %1299 = vmatprep.subr.bf16.mxu1 %v1671_v1 }
 0x129   :  { %1300 = vmatpush3.bf16.msra.mxu1 %v549_v19  ;;  %v667_v19 = vld [vmem:[#allocation14 + $0x1f8] sm:$0xff] }
 0x12a   :  { %1301 = vmatprep.subr.bf16.mxu1 %v1671_v1  ;;  %v718_v24 = vpack.c.bf16 %v672_v20, %v667_v19 }
 0x12d   :  { %1302 = vmatpush3.bf16.msra.mxu1 %v548_v22  ;;  %v722_v22 = vpack.c.bf16 %v681_v18, %v676_v17 }
 0x16c   :  { %v291_v28 = vpop.f32.mrf.mxu0 }
 0x16d   :  { %v292_v41 = vadd.f32 %v1153_v40, %v291_v28  ;;  %v674_v28 = vld [vmem:[#allocation14 + $0x230] sm:$0xff] }
 0x16e   :  { %v1239_v29 = vpop.f32.mrf.mxu0  ;;  %v371_v33 = vpop.f32.mrf.mxu1 }
 0x16f   :  { %v372_v34 = vadd.f32 %v1154_v31, %v371_v33  ;;  %v303_v43 = vmul.f32 %v301_v42, %v292_v41  ;;  %v679_v29 = vld [vmem:[#allocation14 + $0x258] sm:$0xff]  ;;  %v670_v33 = vld [vmem:[#allocation14 + $0x210] sm:$0xff] }
 0x170   :  { %v294_v30 = vpop.f32.mrf.mxu0  ;;  %v1259_v35 = vpop.f32.mrf.mxu1  ;;  %v720_v31 = vpack.c.bf16 %v679_v29, %v674_v28  ;;  %v654_v41 = vld [vmem:[#allocation14 + $0x190] sm:$0xff]  ;;  %v659_v42 = vld [vmem:[#allocation14 + $0x1b8] sm:$0xff] }
 0x171   :  { %v377_v36 = vmax.f32 %v372_v34, 0.0  ;;  %v723_v30 = vpack.c.bf16 %v682_v27, %v677_v25  ;;  %v664_v35 = vld [vmem:[#allocation14 + $0x1e0] sm:$0xff]  ;;  %v666_v25 = vld [vmem:[#allocation14 + $0x1f0] sm:$0xff]  ;;  %v657_v27 = vld [vmem:[#allocation14 + $0x1a8] sm:$0xff] }
 0x172   :  { %v1240_v32 = vpop.f32.mrf.mxu0  ;;  %v374_v37 = vpop.f32.mrf.mxu1  ;;  %v662_v28 = vld [vmem:[#allocation14 + $0x1d0] sm:$0xff] }
 0x173   :  { %v394_v38 = vpack.c.bf16 %v377_v36, %v377_v36  ;;  %v665_v32 = vld [vmem:[#allocation14 + $0x1e8] sm:$0xff]  ;;  %793 = vmatprep.subr.bf16.mxu1 %v723_v30  ;;  %v713_v29 = vpack.c.bf16 %v662_v28, %v657_v27  ;;  %v656_v30 = vld [vmem:[#allocation14 + $0x1a0] sm:$0xff] }
 0x174   :  { %v1260_v39 = vpop.f32.mrf.mxu1  ;;  %v716_v34 = vpack.c.bf16 %v670_v33, %v665_v32  ;;  %v669_v36 = vld [vmem:[#allocation14 + $0x208] sm:$0xff]  ;;  %v647_v32 = vld [vmem:[#allocation14 + $0x158] sm:$0xff]  ;;  %v652_v33 = vld [vmem:[#allocation14 + $0x180] sm:$0xff] }
 0x175   :  { %1278 = vmatmul.mubr.bf16.vlgmr.msra.gmra.mxu0 %v394_v38  ;;  %v715_v37 = vpack.c.bf16 %v669_v36, %v664_v35  ;;  %v655_v38 = vld [vmem:[#allocation14 + $0x198] sm:$0xff]  ;;  %v660_v39 = vld [vmem:[#allocation14 + $0x1c0] sm:$0xff]  ;;  %v708_v35 = vpack.c.bf16 %v652_v33, %v647_v32  ;;  %v646_v36 = vld [vmem:[#allocation14 + $0x150] sm:$0xff] }
 0x176   :  { %784 = vmatprep.mubr.bf16.mxu0 %v1670_v0  ;;  %753 = vmatpush1.bf16.msra.mxu0 %v720_v31  ;;  %v711_v40 = vpack.c.bf16 %v660_v39, %v655_v38  ;;  %v661_v31 = vld [vmem:[#allocation14 + $0x1c8] sm:$0xff]  ;;  %v642_v39 = vld [vmem:[#allocation14 + $0x130] sm:$0xff]  ;;  %v890_v33 = vld [vmem:[#allocation16 + $0x58] sm:$0xff] }
 0x177   :  { %754 = vmatprep.subr.bf16.mxu0 %v716_v34  ;;  %v712_v34 = vpack.c.bf16 %v661_v31, %v656_v30  ;;  %v637_v38 = vld [vmem:[#allocation14 + $0x108] sm:$0xff]  ;;  %v658_v30 = vld [vmem:[#allocation14 + $0x1b0] sm:$0xff]  ;;  %v663_v31 = vld [vmem:[#allocation14 + $0x1d8] sm:$0xff] }
 0x178   :  { %v892_v27 = vld [vmem:[#allocation16 + $0x68] sm:$0xff]  ;;  %v889_v32 = vld [vmem:[#allocation16 + $0x50] sm:$0xff] }
 0x17a   :  { %755 = vmatpush1.bf16.msra.mxu0 %v715_v37  ;;  %v651_v37 = vld [vmem:[#allocation14 + $0x178] sm:$0xff] }
 0x17b   :  { %756 = vmatprep.subr.bf16.mxu0 %v711_v40  ;;  %v707_v40 = vpack.c.bf16 %v651_v37, %v646_v36  ;;  %v648_v36 = vld [vmem:[#allocation14 + $0x160] sm:$0xff]  ;;  %v653_v37 = vld [vmem:[#allocation14 + $0x188] sm:$0xff] }
 0x1d0   :  { %v492_v44 = vpop.f32.mrf.mxu1 }
 0x1d1   :  { %v493_v46 = vadd.f32 %v492_v44, %v303_v43  ;;  %v710_v43 = vpack.c.bf16 %v659_v42, %v654_v41  ;;  %v645_v44 = vld [vmem:[#allocation14 + $0x148] sm:$0xff]  ;;  %v703_v41 = vpack.c.bf16 %v642_v39, %v637_v38  ;;  %v636_v42 = vld [vmem:[#allocation14 + $0x100] sm:$0xff] }
 0x1d2   :  { %v1285_v47 = vpop.f32.mrf.mxu1  ;;  %v887_v38 = vld [vmem:[#allocation16 + $0x40] sm:$0xff]  ;;  %v888_v39 = vld [vmem:[#allocation16 + $0x48] sm:$0xff] }
 0x1d3   :  { %v501_v48 = vmul.f32 %v1157_v45, %v493_v46  ;;  %v644_v47 = vld [vmem:[#allocation14 + $0x140] sm:$0xff]  ;;  %757 = vmatpush1.bf16.msra.mxu0 %v710_v43  ;;  %v641_v43 = vld [vmem:[#allocation14 + $0x128] sm:$0xff] }
 0x1d4   :  { %v495_v49 = vpop.f32.mrf.mxu1 }
 0x1d5   :  { %502 = vadd.xlane.f32.xlu1 %v501_v48 }
 0x1d6   :  { %v1286_v50 = vpop.f32.mrf.mxu1 }
 0x1d7   :  { %v635_v50 = vld [vmem:[#allocation14 + $0xf8] sm:$0xff] }
 0x1d8   :  { %v701_v52 = vpack.c.bf16 %v640_v51, %v635_v50  ;;  %v617_v50 = vld [vmem:[#allocation14 + $0x68] sm:$0xff]  ;;  %v622_v51 = vld [vmem:[#allocation14 + $0x90] sm:$0xff] }
 0x1d9   :  { %v693_v53 = vpack.c.bf16 %v622_v51, %v617_v50  ;;  %v883_v50 = vld [vmem:[#allocation16 + $0x20] sm:$0xff]  ;;  %v884_v51 = vld [vmem:[#allocation16 + $0x28] sm:$0xff] }
 0x235   :  { %v1911_v57 = vpop.f32.mrf.mxu0 }
 0x237   :  { %v1279_v58 = vpop.f32.mrf.mxu0 }
 0x238   :  { %v630_v58 = vld [vmem:[#allocation14 + $0xd0] sm:$0xff] }
 0x239   :  { %v447_v59 = vpop.f32.mrf.mxu0 }
 0x23a   :  { %v696_v59 = vpack.c.bf16 %v630_v58, %v625_v56  ;;  %v605_v58 = vld [vmem:[#allocation14 + $0x8] sm:$0xff] }
 0x23b   :  { %v1280_v60 = vpop.f32.mrf.mxu0 }
 0x23c   :  { %v624_v60 = vld [vmem:[#allocation14 + $0xa0] sm:$0xff] }
 0x25e   :  { %v503_v61 = vpop.xlane.xlu1 %502 }
 0x25f   :  { %v504_v62 = vmul.f32 0.03125, %v503_v61  ;;  %v629_v61 = vld [vmem:[#allocation14 + $0xc8] sm:$0xff] }
 0x261   :  { %v505_v63 = vsub.f32 %v501_v48, %v504_v62  ;;  %v649_v48 = vld [vmem:[#allocation14 + $0x168] sm:$0xff]  ;;  %v695_v62 = vpack.c.bf16 %v629_v61, %v624_v60  ;;  %v607_v60 = vld [vmem:[#allocation14 + $0x18] sm:$0xff] }
 0x262   :  { %v705_v49 = vpack.c.bf16 %v649_v48, %v644_v47  ;;  %v626_v48 = vld [vmem:[#allocation14 + $0xb0] sm:$0xff] }
 0x263   :  { %v1913_v2 = vmul.f32 %v1157_v45, %v505_v63  ;;  %v650_v45 = vld [vmem:[#allocation14 + $0x170] sm:$0xff]  ;;  %v615_v63 = vld [vmem:[#allocation14 + $0x58] sm:$0xff] }
 0x264   :  { %v706_v46 = vpack.c.bf16 %v650_v45, %v645_v44  ;;  %v627_v44 = vld [vmem:[#allocation14 + $0xb8] sm:$0xff]  ;;  %v632_v45 = vld [vmem:[#allocation14 + $0xe0] sm:$0xff] }
 0x265   :  { %v507_v3 = vmul.f32 %v1913_v2, %v1913_v2  ;;  %v698_v47 = vpack.c.bf16 %v632_v45, %v627_v44  ;;  %v885_v44 = vld [vmem:[#allocation16 + $0x30] sm:$0xff]  ;;  %v886_v45 = vld [vmem:[#allocation16 + $0x38] sm:$0xff] }
 0x266   :  { %758 = vmatprep.subr.bf16.mxu0 %v706_v46  ;;  %v702_v46 = vpack.c.bf16 %v641_v43, %v636_v42  ;;  %v638_v42 = vld [vmem:[#allocation14 + $0x110] sm:$0xff]  ;;  %v643_v43 = vld [vmem:[#allocation14 + $0x138] sm:$0xff] }
 0x267   :  { %508 = vadd.xlane.f32.xlu1 %v507_v3  ;;  %759 = vmatpush1.bf16.msra.mxu0 %v705_v49  ;;  %v620_v3 = vld [vmem:[#allocation14 + $0x80] sm:$0xff]  ;;  %v631_v49 = vld [vmem:[#allocation14 + $0xd8] sm:$0xff] }
 0x268   :  { %760 = vmatprep.subr.bf16.mxu0 %v701_v52  ;;  %v691_v4 = vpack.c.bf16 %v620_v3, %v615_v63  ;;  %v697_v52 = vpack.c.bf16 %v631_v49, %v626_v48  ;;  %v604_v63 = vld [vmem:[#allocation14] sm:$0xff]  ;;  %v609_v3 = vld [vmem:[#allocation14 + $0x28] sm:$0xff] }
 0x269   :  { %v685_v5 = vpack.c.bf16 %v609_v3, %v604_v63  ;;  %v628_v48 = vld [vmem:[#allocation14 + $0xc0] sm:$0xff]  ;;  %v633_v49 = vld [vmem:[#allocation14 + $0xe8] sm:$0xff] }
 0x26a   :  { %v613_v63 = vld [vmem:[#allocation14 + $0x48] sm:$0xff]  ;;  %v879_v3 = vld [vmem:[#allocation16] sm:$0xff] }
 0x26b   :  { %761 = vmatpush1.bf16.msra.mxu0 %v700_v55  ;;  %v621_v55 = vld [vmem:[#allocation14 + $0x88] sm:$0xff] }
 0x26c   :  { %762 = vmatprep.subr.bf16.mxu0 %v696_v59  ;;  %v692_v56 = vpack.c.bf16 %v621_v55, %v616_v54  ;;  %v610_v59 = vld [vmem:[#allocation14 + $0x30] sm:$0xff]  ;;  %v623_v55 = vld [vmem:[#allocation14 + $0x98] sm:$0xff] }
 0x26d   :  { %v686_v61 = vpack.c.bf16 %v610_v59, %v605_v58  ;;  %v618_v54 = vld [vmem:[#allocation14 + $0x70] sm:$0xff]  ;;  %v882_v58 = vld [vmem:[#allocation16 + $0x18] sm:$0xff]  ;;  %v1155_v59 = vld [vmem:[%s2021_s12] ss:$0 sm:$0xff] }
 0x26f   :  { %763 = vmatpush1.bf16.msra.mxu0 %v695_v62  ;;  %v612_v62 = vld [vmem:[#allocation14 + $0x40] sm:$0xff] }
 0x270   :  { %764 = vmatprep.subr.bf16.mxu0 %v691_v4  ;;  %v688_v4 = vpack.c.bf16 %v612_v62, %v607_v60  ;;  %v694_v60 = vpack.c.bf16 %v623_v55, %v618_v54  ;;  %v608_v62 = vld [vmem:[#allocation14 + $0x20] sm:$0xff]  ;;  %v1003_v55 = vld [vmem:[#allocation17 + $0x10] sm:$0xff] }
 0x271   :  { %v1001_v54 = vld [vmem:[#allocation17] sm:$0xff] }
 0x273   :  { %765 = vmatpush1.bf16.msra.mxu0 %v690_v7  ;;  %v611_v7 = vld [vmem:[#allocation14 + $0x38] sm:$0xff] }
 0x274   :  { %766 = vmatprep.subr.bf16.mxu0 %v686_v61 }
 0x277   :  { %767 = vmatpush1.bf16.msra.mxu0 %v685_v5  ;;  %v445_v5 = vadd.f32 %v1155_v59, %v1911_v57  ;;  %v950_v57 = vld [vmem:[%s2054_s11] sm:$0xff] }
 0x278   :  { %1307 = vmatprep.subr.bf16.mxu0 %v1671_v1 }
 0x2f0   :  { %v509_v8 = vpop.xlane.xlu1 %508 }
 0x2f1   :  { %v510_v9 = vmul.f32 0.03125, %v509_v8  ;;  %v687_v8 = vpack.c.bf16 %v611_v7, %v606_v6  ;;  %v689_v6 = vpack.c.bf16 %v613_v63, %v608_v62 }
 0x2f3   :  { %v511_v10 = vadd.f32 1e-05, %v510_v9  ;;  %v1160_v9 = vld [vmem:[%s2025_s16] ss:$0 sm:$0xff] }
 0x2f5   :  { %1376 = vrsqrt.f32 %v511_v10 }
 0x302   :  { %v1377_v11 = vpop.eup %1376 }
 0x303   :  { %v513_v13 = vmul.f32 %v1377_v11, %v1913_v2  ;;  %v717_v2 = vpack.c.bf16 %v671_v26, %v666_v25  ;;  %v678_v11 = vld [vmem:[#allocation14 + $0x250] sm:$0xff]  ;;  %v673_v25 = vld [vmem:[#allocation14 + $0x228] sm:$0xff]  ;;  %v891_v26 = vld [vmem:[#allocation16 + $0x60] sm:$0xff] }
 0x305   :  { %v521_v15 = vmul.f32 %v1158_v12, %v513_v13  ;;  %v683_v13 = vld [vmem:[#allocation14 + $0x278] sm:$0xff] }
 0x306   :  { %v724_v20 = vpack.c.bf16 %v683_v13, %v678_v11  ;;  %v1030_v11 = vld [vmem:[#allocation17 + $0xe8] sm:$0xff]  ;;  %v1029_v13 = vld [vmem:[#allocation17 + $0xe0] sm:$0xff] }
 0x307   :  { %v529_v21 = vadd.f32 %v1159_v14, %v521_v15  ;;  %v893_v14 = vld [vmem:[#allocation16 + $0x70] sm:$0xff]  ;;  %v894_v15 = vld [vmem:[#allocation16 + $0x78] sm:$0xff] }
 0x309   :  { %v1929_v23 = vpack.c.bf16 %v529_v21, %v529_v21  ;;  %530 = vst [vmem:[#allocation19] sm:$0xff] %v529_v21  ;;  %v902_v21 = vpack.c.bf16 %v894_v15, %v893_v14  ;;  %v1031_v15 = vld [vmem:[#allocation17 + $0xf0] sm:$0xff] }
 0x30b   :  { %1304 = vmatmul.mubr.bf16.vlgmr.msra.gmra.mxu1 %v1929_v23 }
 0x30c   :  { %794 = vmatpush1.bf16.msra.mxu1 %v722_v22  ;;  %825 = vmatprep.mubr.bf16.mxu1 %v1670_v0  ;;  %v668_v22 = vld [vmem:[#allocation14 + $0x200] sm:$0xff] }
 0x30d   :  { %795 = vmatprep.subr.bf16.mxu1 %v718_v24 }
 0x310   :  { %796 = vmatpush1.bf16.msra.mxu1 %v717_v2  ;;  %v719_v2 = vpack.c.bf16 %v673_v25, %v668_v22  ;;  %v1024_v22 = vld [vmem:[#allocation17 + $0xb8] sm:$0xff]  ;;  %v1021_v25 = vld [vmem:[#allocation17 + $0xa0] sm:$0xff] }
 0x311   :  { %797 = vmatprep.subr.bf16.mxu1 %v713_v29  ;;  %v901_v29 = vpack.c.bf16 %v892_v27, %v891_v26  ;;  %v1023_v26 = vld [vmem:[#allocation17 + $0xb0] sm:$0xff]  ;;  %v1018_v27 = vld [vmem:[#allocation17 + $0x88] sm:$0xff] }
 0x314   :  { %798 = vmatpush1.bf16.msra.mxu1 %v712_v34  ;;  %v714_v34 = vpack.c.bf16 %v663_v31, %v658_v30  ;;  %v1017_v30 = vld [vmem:[#allocation17 + $0x80] sm:$0xff]  ;;  %v1019_v31 = vld [vmem:[#allocation17 + $0x90] sm:$0xff] }
 0x315   :  { %799 = vmatprep.subr.bf16.mxu1 %v708_v35  ;;  %v900_v35 = vpack.c.bf16 %v890_v33, %v889_v32  ;;  %v1014_v32 = vld [vmem:[#allocation17 + $0x68] sm:$0xff]  ;;  %v1016_v33 = vld [vmem:[#allocation17 + $0x78] sm:$0xff] }
 0x318   :  { %800 = vmatpush1.bf16.msra.mxu1 %v707_v40  ;;  %v709_v40 = vpack.c.bf16 %v653_v37, %v648_v36  ;;  %v1013_v36 = vld [vmem:[#allocation17 + $0x60] sm:$0xff]  ;;  %v1015_v37 = vld [vmem:[#allocation17 + $0x70] sm:$0xff] }
 0x319   :  { %801 = vmatprep.subr.bf16.mxu1 %v703_v41  ;;  %v899_v41 = vpack.c.bf16 %v888_v39, %v887_v38  ;;  %v1040_v38 = vpack.c.bf16 %v1015_v37, %v1013_v36  ;;  %v1010_v39 = vld [vmem:[#allocation17 + $0x48] sm:$0xff] }
 0x31c   :  { %802 = vmatpush1.bf16.msra.mxu1 %v702_v46  ;;  %v704_v46 = vpack.c.bf16 %v643_v43, %v638_v42  ;;  %v1009_v42 = vld [vmem:[#allocation17 + $0x40] sm:$0xff]  ;;  %v1011_v43 = vld [vmem:[#allocation17 + $0x50] sm:$0xff] }
 0x31d   :  { %803 = vmatprep.subr.bf16.mxu1 %v698_v47  ;;  %v898_v47 = vpack.c.bf16 %v886_v45, %v885_v44  ;;  %v1038_v44 = vpack.c.bf16 %v1011_v43, %v1009_v42  ;;  %v1006_v45 = vld [vmem:[#allocation17 + $0x28] sm:$0xff] }
 0x320   :  { %804 = vmatpush1.bf16.msra.mxu1 %v697_v52  ;;  %v699_v52 = vpack.c.bf16 %v633_v49, %v628_v48  ;;  %v1005_v48 = vld [vmem:[#allocation17 + $0x20] sm:$0xff]  ;;  %v1007_v49 = vld [vmem:[#allocation17 + $0x30] sm:$0xff] }
 0x321   :  { %805 = vmatprep.subr.bf16.mxu1 %v693_v53  ;;  %v897_v53 = vpack.c.bf16 %v884_v51, %v883_v50  ;;  %v1036_v50 = vpack.c.bf16 %v1007_v49, %v1005_v48  ;;  %v1002_v51 = vld [vmem:[#allocation17 + $0x8] sm:$0xff] }
 0x324   :  { %806 = vmatpush1.bf16.msra.mxu1 %v692_v56  ;;  %v881_v56 = vld [vmem:[#allocation16 + $0x10] sm:$0xff] }
 0x325   :  { %807 = vmatprep.subr.bf16.mxu1 %v688_v4  ;;  %v896_v61 = vpack.c.bf16 %v882_v58, %v881_v56  ;;  %v880_v4 = vld [vmem:[#allocation16 + $0x8] sm:$0xff]  ;;  %v1034_v56 = vpack.c.bf16 %v1003_v55, %v1001_v54  ;;  %v1976_v58 = vshrl.u32 %v211_v16, 7 }
 0x326   :  { %v895_v7 = vpack.c.bf16 %v880_v4, %v879_v3 }
 0x327   :  { %v729_v59 = vsub.s32 0, %v1976_v58  ;;  %v733_v62 = vsub.s32 1, %v1976_v58  ;;  %v741_v63 = vsub.s32 3, %v1976_v58 }
 0x328   :  { %808 = vmatpush1.bf16.msra.mxu1 %v687_v8  ;;  %v952_v8 = vpack.c.bf16 %v445_v5, %v445_v5 }
 0x329   :  { %1327 = vmatprep.subr.bf16.mxu1 %v1671_v1 }
 0x3cb   :  { %v597_v10 = vpop.f32.mrf.mxu1 }
 0x3cc   :  { %v598_v12 = vadd.f32 %v1160_v9, %v597_v10  ;;  %v957_v9 = vsel %vm454_vm1, %v952_v8, 0  ;;  %v951_v10 = vpack.c.bf16 %v950_v57, %v950_v57 }
 0x3cd   :  { %v1305_v17 = vpop.f32.mrf.mxu1 }
 0x3ce   :  { %v603_v18 = vmax.f32 %v598_v12, 0.0  ;;  %v1032_v12 = vld [vmem:[#allocation17 + $0xf8] sm:$0xff]  ;;  %v1026_v17 = vld [vmem:[#allocation17 + $0xc8] sm:$0xff] }
 0x3cf   :  { %v600_v19 = vpop.f32.mrf.mxu1  ;;  %v1049_v14 = vpack.c.bf16 %v1032_v12, %v1030_v11 }
 0x3d0   :  { %v1938_v24 = vpack.c.bf16 %v603_v18, %v603_v18  ;;  %v1048_v18 = vpack.c.bf16 %v1031_v15, %v1029_v13 }
 0x3d1   :  { %v1306_v28 = vpop.f32.mrf.mxu1 }
 0x3d2   :  { %785 = vmatmul.mubr.bf16.vlgmr.msra.gmra.mxu0 %v1938_v24  ;;  %826 = vmatmul.mubr.bf16.vlgmr.msra.gmra.mxu1 %v1938_v24  ;;  %v1020_v28 = vld [vmem:[#allocation17 + $0x98] sm:$0xff] }
 0x3d3   :  { %1308 = vmatpush3.bf16.msra.mxu0 %v724_v20  ;;  %1328 = vmatpush3.bf16.msra.mxu1 %v902_v21  ;;  %v1025_v20 = vld [vmem:[#allocation17 + $0xc0] sm:$0xff]  ;;  %v1022_v21 = vld [vmem:[#allocation17 + $0xa8] sm:$0xff] }
 0x3d4   :  { %1309 = vmatprep.subr.bf16.mxu0 %v1671_v1  ;;  %1329 = vmatprep.subr.bf16.mxu1 %v1671_v1 }
 0x3d5   :  { %1323 = vmatprep.mubr.msk.bf16.mxu0 %vm1672_vm0, %v1671_v1  ;;  %1343 = vmatprep.mubr.msk.bf16.mxu1 %vm1672_vm0, %v1671_v1 }
 0x3d7   :  { %1310 = vmatpush3.bf16.msra.mxu0 %v719_v2  ;;  %1330 = vmatpush3.bf16.msra.mxu1 %v901_v29  ;;  %v1044_v2 = vpack.c.bf16 %v1023_v26, %v1021_v25  ;;  %v1043_v29 = vpack.c.bf16 %v1020_v28, %v1018_v27 }
 0x3d8   :  { %1311 = vmatprep.subr.bf16.mxu0 %v1671_v1  ;;  %1331 = vmatprep.subr.bf16.mxu1 %v1671_v1 }
 0x3db   :  { %1312 = vmatpush3.bf16.msra.mxu0 %v714_v34  ;;  %1332 = vmatpush3.bf16.msra.mxu1 %v900_v35  ;;  %v1042_v34 = vpack.c.bf16 %v1019_v31, %v1017_v30  ;;  %v1041_v35 = vpack.c.bf16 %v1016_v33, %v1014_v32 }
 0x3dc   :  { %1313 = vmatprep.subr.bf16.mxu0 %v1671_v1  ;;  %1333 = vmatprep.subr.bf16.mxu1 %v1671_v1 }
 0x3df   :  { %1314 = vmatpush3.bf16.msra.mxu0 %v709_v40  ;;  %1334 = vmatpush3.bf16.msra.mxu1 %v899_v41  ;;  %v1012_v40 = vld [vmem:[#allocation17 + $0x58] sm:$0xff] }
 0x3e0   :  { %1315 = vmatprep.subr.bf16.mxu0 %v1671_v1  ;;  %1335 = vmatprep.subr.bf16.mxu1 %v1671_v1  ;;  %v1039_v41 = vpack.c.bf16 %v1012_v40, %v1010_v39 }
 0x3e3   :  { %1316 = vmatpush3.bf16.msra.mxu0 %v704_v46  ;;  %1336 = vmatpush3.bf16.msra.mxu1 %v898_v47  ;;  %v1008_v46 = vld [vmem:[#allocation17 + $0x38] sm:$0xff] }
 0x3e4   :  { %1317 = vmatprep.subr.bf16.mxu0 %v1671_v1  ;;  %1337 = vmatprep.subr.bf16.mxu1 %v1671_v1  ;;  %v1037_v47 = vpack.c.bf16 %v1008_v46, %v1006_v45 }
 0x3e7   :  { %1318 = vmatpush3.bf16.msra.mxu0 %v699_v52  ;;  %1338 = vmatpush3.bf16.msra.mxu1 %v897_v53  ;;  %v1004_v52 = vld [vmem:[#allocation17 + $0x18] sm:$0xff] }
 0x3e8   :  { %1319 = vmatprep.subr.bf16.mxu0 %v1671_v1  ;;  %1339 = vmatprep.subr.bf16.mxu1 %v1671_v1  ;;  %v1035_v53 = vpack.c.bf16 %v1004_v52, %v1002_v51 }
 0x3eb   :  { %1320 = vmatpush3.bf16.msra.mxu0 %v694_v60  ;;  %1340 = vmatpush3.bf16.msra.mxu1 %v896_v61  ;;  %v737_v60 = vsub.s32 2, %v1976_v58  ;;  %v725_v61 = vld [vmem:[%s2027_s18] sm:$0x1f] }
 0x3ec   :  { %1321 = vmatprep.subr.bf16.mxu0 %v1671_v1  ;;  %1341 = vmatprep.subr.bf16.mxu1 %v1671_v1  ;;  %v730_v3 = vrot.slane %v725_v61, %v729_v59  ;;  %v734_v16 = vrot.slane %v725_v61, %v733_v62  ;;  %v742_v5 = vrot.slane %v725_v61, %v741_v63 }
 0x3ed   :  { %v738_v4 = vrot.slane %v725_v61, %v737_v60 }
 0x3ef   :  { %1322 = vmatpush3.bf16.msra.mxu0 %v689_v6  ;;  %1342 = vmatpush3.bf16.msra.mxu1 %v895_v7 }
 0x3f0   :  { %1347 = vmatprep.subr.bf16.mxu1 %v1671_v1  ;;  %1062 = vmatprep.subr.bf16.mxu0 %v1049_v14 }
 0x3f2   :  { %1324 = vmatmul.mubr.bf16.vlgmr.msra.gmra.mxu0 %v1938_v24  ;;  %1344 = vmatmul.mubr.bf16.vlgmr.msra.gmra.mxu1 %v1929_v23  ;;  %v1028_v23 = vld [vmem:[#allocation17 + $0xd8] sm:$0xff] }
 0x3f3   :  { %1348 = vmatpush3.bf16.msra.mxu1 %v957_v9  ;;  %1349 = vmatprep.mubr.msk.bf16.mxu1 %vm1672_vm0, %v1671_v1  ;;  %v1047_v19 = vpack.c.bf16 %v1028_v23, %v1026_v17  ;;  %v1027_v1 = vld [vmem:[#allocation17 + $0xd0] sm:$0xff]  ;;  %v745_v23 = vsub.s32 4, %v1976_v58 }
 0x3f4   :  { %1094 = vmatprep.mubr.bf16.mxu0 %v1670_v0  ;;  %1063 = vmatpush1.bf16.msra.mxu0 %v1048_v18  ;;  %v1046_v24 = vpack.c.bf16 %v1027_v1, %v1025_v20  ;;  %v1045_v0 = vpack.c.bf16 %v1024_v22, %v1022_v21 }
 0x3f5   :  { %1064 = vmatprep.subr.bf16.mxu0 %v1047_v19  ;;  %v746_v18 = vrot.slane %v725_v61, %v745_v23 }
 0x3f8   :  { %1065 = vmatpush1.bf16.msra.mxu0 %v1046_v24  ;;  %v1161_v24 = vld [vmem:[%s2029_s20] ss:$0 sm:$0xff] }
 0x3f9   :  { %1066 = vmatprep.subr.bf16.mxu0 %v1045_v0 }
 0x3fa   :  { %1350 = vmatmul.mubr.msk.bf16.vlgmr.msra.gmra.mxu1 %vm450_vm3, %v951_v10 }
 0x3fc   :  { %1067 = vmatpush1.bf16.msra.mxu0 %v1044_v2 }
 0x3fd   :  { %1068 = vmatprep.subr.bf16.mxu0 %v1043_v29 }
 0x400   :  { %1069 = vmatpush1.bf16.msra.mxu0 %v1042_v34 }
 0x401   :  { %1070 = vmatprep.subr.bf16.mxu0 %v1041_v35 }
 0x404   :  { %1071 = vmatpush1.bf16.msra.mxu0 %v1040_v38 }
 0x405   :  { %1072 = vmatprep.subr.bf16.mxu0 %v1039_v41 }
 0x408   :  { %1073 = vmatpush1.bf16.msra.mxu0 %v1038_v44 }
 0x409   :  { %1074 = vmatprep.subr.bf16.mxu0 %v1037_v47 }
 0x40c   :  { %1075 = vmatpush1.bf16.msra.mxu0 %v1036_v50 }
 0x40d   :  { %1076 = vmatprep.subr.bf16.mxu0 %v1035_v53 }
 0x410   :  { %1077 = vmatpush1.bf16.msra.mxu0 %v1034_v56 }
 0x492   :  { %v786_v6 = vpop.f32.mrf.mxu0  ;;  %v827_v7 = vpop.f32.mrf.mxu1 }
 0x493   :  { %v787_v8 = vadd.f32 %v786_v6, %v730_v3  ;;  %v828_v9 = vadd.f32 %v827_v7, %v738_v4 }
 0x494   :  { %v788_v57 = vpop.f32.mrf.mxu0  ;;  %v829_v10 = vpop.f32.mrf.mxu1 }
 0x495   :  { %874 = vst [vmem:[#allocation20] sm:$0xff] %v787_v8  ;;  %876 = vst [vmem:[#allocation20 + $0x10] sm:$0xff] %v828_v9  ;;  %v789_v11 = vadd.f32 %v788_v57, %v734_v16  ;;  %v830_v12 = vadd.f32 %v829_v10, %v742_v5 }
 0x496   :  { %v790_v13 = vpop.f32.mrf.mxu0  ;;  %v831_v14 = vpop.f32.mrf.mxu1 }
 0x497   :  { %875 = vst [vmem:[#allocation20 + $0x8] sm:$0xff] %v789_v11  ;;  %877 = vst [vmem:[#allocation20 + $0x18] sm:$0xff] %v830_v12 }
 0x498   :  { %v791_v15 = vpop.f32.mrf.mxu0  ;;  %v832_v17 = vpop.f32.mrf.mxu1 }
 0x4b2   :  { %v868_v19 = vpop.f32.mrf.mxu0  ;;  %v944_v20 = vpop.f32.mrf.mxu1 }
 0x4b3   :  { %v869_v1 = vadd.f32 %v868_v19, %v746_v18  ;;  %v945_v28 = vadd.f32 %v1161_v24, %v944_v20 }
 0x4b4   :  { %v1325_v21 = vpop.f32.mrf.mxu0  ;;  %v1345_v22 = vpop.f32.mrf.mxu1 }
 0x4b5   :  { %878 = vst [vmem:[#allocation20 + $0x20] sm:$0xff] %v869_v1 }
 0x4b6   :  { %v871_v0 = vpop.f32.mrf.mxu0  ;;  %v947_v25 = vpop.f32.mrf.mxu1 }
 0x4b8   :  { %v1326_v26 = vpop.f32.mrf.mxu0  ;;  %v1346_v27 = vpop.f32.mrf.mxu1 }
 0x4ba   :  { %v993_v2 = vpop.f32.mrf.mxu1 }
 0x4bb   :  { %v999_v29 = vadd.f32 %v993_v2, %v945_v28 }
 0x4bc   :  { %v1351_v30 = vpop.f32.mrf.mxu1 }
 0x4bd   :  { %v1000_v31 = vmax.f32 %v999_v29, 0.0 }
 0x4be   :  { %v996_v32 = vpop.f32.mrf.mxu1 }
 0x4bf   :  { %v1033_v33 = vpack.c.bf16 %v1000_v31, %v1000_v31 }
 0x4c0   :  { %v1352_v34 = vpop.f32.mrf.mxu1 }
 0x4c1   :  { %1095 = vmatmul.mubr.bf16.vlgmr.msra.gmra.mxu0 %v1033_v33 }
 0x4c2   :  { %1589 = shalt.err (!%p1586_p12)
}
 0x4c3   :  { %1124 = dma.vmem_to_hbm [thread:$0]  %s1122_s0, 640, %s2033_s24, [#allocation21]  }
 0x4c4   :  { %s1598_s17 = scalar_lea.vmem %s1112_s26, 128  ;;  %p1603_p0 = scmp.lt.s32.totalorder %s1112_s26, %s1112_s26 }
 0x4c5   :  { %p1599_p13 = scmp.ne.s32.totalorder %s1112_s26, %s1598_s17  ;;  %p1604_p1 = scmp.lt.s32.totalorder %s1598_s17, %s1598_s17 }
 0x4c7   :  { %p1605_p2 = por %p1604_p1, %p1603_p0 }
 0x4c9   :  { %p1606_p3 = pnand %p1605_p2, %p1599_p13 }
 0x4cb   :  { %1609 = shalt.err (!%p1606_p3)
}
 0x4cc   :  { %1114 = dma.vmem_to_hbm [thread:$0]  %s1112_s26, 128, %s2032_s23, [#allocation4]   ;;  %v1050_v35 = vld [vmem:[%s2031_s22] sm:$0x3] }
 0x4cd   :  { %v1055_v36 = vrot.slane %v1050_v35, %v729_v59  ;;  %v1059_v37 = vrot.slane %v1050_v35, %v733_v62  ;;  %s1675_s24 = smov [#allocation22]  }
 0x4ce   :  { %s1131_s10 = sshll.u32 %s1675_s24, 4  ;;  %s1132_s10 = int_to_ptr.vmem [resolvable:$true] %s1131_s10 }
 0x4cf   :  { %s1618_s23 = scalar_lea.vmem %s1132_s10, 256  ;;  %p1623_p5 = scmp.lt.s32.totalorder %s1132_s10, %s1132_s10 }
 0x4d0   :  { %p1619_p4 = scmp.ne.s32.totalorder %s1132_s10, %s1618_s23  ;;  %p1624_p6 = scmp.lt.s32.totalorder %s1618_s23, %s1618_s23 }
 0x4d2   :  { %p1625_p7 = por %p1624_p6, %p1623_p5 }
 0x4d4   :  { %p1626_p8 = pnand %p1625_p7, %p1619_p4 }
 0x581   :  { %v1096_v38 = vpop.f32.mrf.mxu0 }
 0x582   :  { %v1097_v39 = vadd.f32 %v1096_v38, %v1055_v36 }
 0x583   :  { %v1098_v40 = vpop.f32.mrf.mxu0 }
 0x584   :  { %1103 = vst [vmem:[#allocation22] sm:$0xff] %v1097_v39  ;;  %v1099_v41 = vadd.f32 %v1098_v40, %v1059_v37 }
 0x585   :  { %v1100_v42 = vpop.f32.mrf.mxu0 }
 0x586   :  { %1104 = vst [vmem:[#allocation22 + $0x8] sm:$0xff] %v1099_v41 }
 0x587   :  { %v1101_v43 = vpop.f32.mrf.mxu0 }
 0x588   :  { %1629 = shalt.err (!%p1626_p8)
}
 0x589   :  { %1134 = dma.vmem_to_hbm [thread:$0]  %s1132_s10, 256, %s2034_s25, [#allocation21]  }
 0x58a   :  { %1650 = dma.done.wait [#allocation4], 128  }
 0x58b   :  { %1651 = vsyncadd [#allocation4], 4294967168 }
 0x58c   :  { %1652 = dma.done.wait [#allocation21], 896  }
 0x58d   :  { %1653 = vsyncadd [#allocation21], 4294966400 }
 0x58e   :  { %1144 = vsyncpa [#allocation3], 1 }
 0x58f   :  { %1145 = vsyncpa [#allocation6], 1 }
 0x590   :  { %1146 = vsyncpa [#allocation9], 1 }
 0x591   :  { %1147 = vsyncpa [#allocation12], 1 }
 0x592   :  { %1148 = vsyncpa [#allocation15], 1 }
 0x593   :  { %1149 = vsyncpa [#allocation18], 1 }
 0x594   :  { %1150 = vsyncpa [#allocation4], 1 }
 0x595   :  { %1151 = vsyncpa [#allocation21], 1 }

</bundles_post_ra>
